<compile_context>
chip_gen: v5e
topology: v5e:2x2
jax: 0.10.0
libtpu: 0.0.40
codegen_flags: <defaults>
</compile_context>

<pallas_src>
import jax
import jax.numpy as jnp
from jax import lax
from jax.experimental import pallas as pl
from jax.experimental.pallas import tpu as pltpu

EPS = 1e-5
LANE = 128
VMEM_LIMIT = 32 * 1024 * 1024   # well within scoped limits on v5e/v6e/v7x


# ----------------------------- Pallas kernels ------------------------------ #

def _conv_bias_stats_kernel(x_ref, w_ref, b_ref, z_ref, st_ref):
    """3x3 SAME conv (+bias) of one padded NHWC image, plus sum / sum-of-squares.

    x_ref : (H+2, W+2, Ci)  bf16   spatially padded input image
    w_ref : (9, Ci, Cp)     bf16   tap-major weights (tap = ky*3 + kx)
    b_ref : (1, Cp)         f32    bias (padded to 128 lanes)
    z_ref : (H, W, Cp)      f32    conv+bias output (pre-BN cache)
    st_ref: (2, Cp)         f32    [sum, sum_of_squares] over this image
    """
    H, W, Cp = z_ref.shape

    def row_body(h, carry):
        s, sq = carry
        acc = jnp.zeros((W, Cp), jnp.float32)
        for ky in range(3):
            row = x_ref[h + ky]                          # (W+2, Ci) bf16
            for kx in range(3):
                acc += jnp.dot(row[kx:kx + W, :], w_ref[3 * ky + kx],
                               preferred_element_type=jnp.float32)
        zrow = acc + b_ref[...]                          # (W, Cp) f32
        z_ref[h] = zrow
        s = s + jnp.sum(zrow, axis=0, keepdims=True)
        sq = sq + jnp.sum(zrow * zrow, axis=0, keepdims=True)
        return s, sq

    zero = jnp.zeros((1, Cp), jnp.float32)
    s, sq = lax.fori_loop(0, H, row_body, (zero, zero))
    st_ref[0:1, :] = s
    st_ref[1:2, :] = sq


def _bn_relu_kernel(z_ref, sc_ref, sh_ref, o_ref):
    # Per-element FMA + max with a lane-dense (multiple-of-128) output.
    y = z_ref[...] * sc_ref[...] + sh_ref[...]
    o_ref[...] = jnp.maximum(y, 0.0).astype(o_ref.dtype)


# ------------------------------ pallas_call wrappers ------------------------ #

def _conv_bias_stats(xp, w9, b, cp):
    n, hp2, wp2, ci = xp.shape
    h, w = hp2 - 2, wp2 - 2
    return pl.pallas_call(
        _conv_bias_stats_kernel,
        grid=(n,),
        in_specs=[
            pl.BlockSpec((None, hp2, wp2, ci), lambda i: (i, 0, 0, 0)),
            pl.BlockSpec((9, ci, cp), lambda i: (0, 0, 0)),
            pl.BlockSpec((1, cp), lambda i: (0, 0)),
        ],
        out_specs=(
            pl.BlockSpec((None, h, w, cp), lambda i: (i, 0, 0, 0)),
            pl.BlockSpec((None, 2, cp), lambda i: (i, 0, 0)),
        ),
        out_shape=(
            jax.ShapeDtypeStruct((n, h, w, cp), jnp.float32),
            jax.ShapeDtypeStruct((n, 2, cp), jnp.float32),
        ),
        compiler_params=pltpu.CompilerParams(
            dimension_semantics=("parallel",),
            vmem_limit_bytes=VMEM_LIMIT,
        ),
    )(xp, w9, b)


def _bn_relu(z_flat, scale, shift, out_dtype, tile_m):
    m, cp = z_flat.shape
    return pl.pallas_call(
        _bn_relu_kernel,
        grid=(m // tile_m,),
        in_specs=[
            pl.BlockSpec((tile_m, cp), lambda i: (i, 0)),
            pl.BlockSpec((1, cp), lambda i: (0, 0)),
            pl.BlockSpec((1, cp), lambda i: (0, 0)),
        ],
        out_specs=pl.BlockSpec((tile_m, cp), lambda i: (i, 0)),
        out_shape=jax.ShapeDtypeStruct((m, cp), out_dtype),
        compiler_params=pltpu.CompilerParams(
            dimension_semantics=("parallel",),
            vmem_limit_bytes=VMEM_LIMIT,
        ),
    )(z_flat, scale, shift)


# --------------------------------- helpers --------------------------------- #

def _round_up(x, m):
    return ((x + m - 1) // m) * m


def _pick_tile(m):
    for t in (1024, 512, 256, 128, 64, 32, 16, 8):
        if t <= m and m % t == 0:
            return t
    return m


def _prep_weights(w_oihw, ci_pad, co_pad):
    """PyTorch (Cout, Cin, 3, 3) -> (9, ci_pad, co_pad) bf16, tap = ky*3 + kx."""
    co, ci, kh, kw = w_oihw.shape
    w = jnp.transpose(w_oihw, (2, 3, 1, 0)).reshape(kh * kw, ci, co)
    w = jnp.pad(w, ((0, 0), (0, ci_pad - ci), (0, co_pad - co)))
    return w.astype(jnp.bfloat16)


def _pad_vec(v, cp):
    return jnp.pad(v, (0, cp - v.shape[0])).astype(jnp.float32)


def _bn_scale_shift(stats, gamma_p, beta_p, count):
    """Fold per-image sum / sumsq partials into per-channel scale & shift."""
    s = jnp.sum(stats[:, 0, :], axis=0)
    sq = jnp.sum(stats[:, 1, :], axis=0)
    mean = s / count
    var = jnp.maximum(sq / count - mean * mean, 0.0)     # biased variance
    scale = gamma_p * lax.rsqrt(var + EPS)
    shift = beta_p - mean * scale
    return scale.reshape(1, -1), shift.reshape(1, -1)


# ------------------------------ DecoderBlock ------------------------------- #

@jax.jit
def decoder_block(x_nchw, params):
    n, cin, h, w = x_nchw.shape
    cout = params["w1"].shape[0]
    cp = _round_up(cout, LANE)          # lane-dense padded channel count
    ci1 = _round_up(cin, 8)             # sublane-friendly K for conv1
    m = n * h * w
    tile_m = _pick_tile(m)

    # NCHW -> NHWC, bf16 for the MXU, zero halo + zero channel padding.
    x = jnp.transpose(x_nchw, (0, 2, 3, 1)).astype(jnp.bfloat16)
    xp = jnp.pad(x, ((0, 0), (1, 1), (1, 1), (0, ci1 - cin)))

    # conv1 + bias: cache pre-BN output + per-image sum/sumsq (pass 1).
    z1, st1 = _conv_bias_stats(xp, _prep_weights(params["w1"], ci1, cp),
                               _pad_vec(params["b1"], cp).reshape(1, cp), cp)
    sc1, sh1 = _bn_scale_shift(st1, _pad_vec(params["g1"], cp),
                               _pad_vec(params["beta1"], cp), m)
    # BN1 + ReLU (pass 2), written lane-dense bf16 in the layout conv2 reads.
    y1 = _bn_relu(z1.reshape(m, cp), sc1, sh1, jnp.bfloat16, tile_m)

    # conv2 + bias (only a cheap spatial-halo pad between the two convs).
    y1p = jnp.pad(y1.reshape(n, h, w, cp), ((0, 0), (1, 1), (1, 1), (0, 0)))
    z2, st2 = _conv_bias_stats(y1p, _prep_weights(params["w2"], cp, cp),
                               _pad_vec(params["b2"], cp).reshape(1, cp), cp)
    sc2, sh2 = _bn_scale_shift(st2, _pad_vec(params["g2"], cp),
                               _pad_vec(params["beta2"], cp), m)
    # BN2 + ReLU.
    y2 = _bn_relu(z2.reshape(m, cp), sc2, sh2, jnp.float32, tile_m)

    y2 = y2.reshape(n, h, w, cp)[:, :, :, :cout]
    return jnp.transpose(y2, (0, 3, 1, 2))               # NHWC -> NCHW


# -------------------------------- reference -------------------------------- #

def _ref_decoder_block(x, params, gemm_dtype=None):
    """Pure-JAX reference mirroring the PyTorch forward (training-mode BN).

    gemm_dtype=None     -> full f32 reference.
    gemm_dtype=bfloat16 -> matches kernel precision (bf16 GEMM inputs, f32
                           accumulation, f32 BN, bf16 intermediate y1).
    """
    def conv(x, w, b):
        if gemm_dtype is not None:
            x = x.astype(gemm_dtype)
            w = w.astype(gemm_dtype)
        y = lax.conv_general_dilated(
            x, w, window_strides=(1, 1), padding="SAME",
            dimension_numbers=("NCHW", "OIHW", "NCHW"),
            preferred_element_type=jnp.float32,
            precision=lax.Precision.HIGHEST)
        return y + b[None, :, None, None]

    def bn(x, g, bt):
        mean = jnp.mean(x, axis=(0, 2, 3), keepdims=True)
        var = jnp.var(x, axis=(0, 2, 3), keepdims=True)    # biased (ddof=0)
        return ((x - mean) * lax.rsqrt(var + EPS) * g[None, :, None, None]
                + bt[None, :, None, None])

    y1 = jnp.maximum(bn(conv(x, params["w1"], params["b1"]),
                        params["g1"], params["beta1"]), 0.0)
    if gemm_dtype is not None:
        y1 = y1.astype(gemm_dtype).astype(jnp.float32)
    y2 = jnp.maximum(bn(conv(y1, params["w2"], params["b2"]),
                        params["g2"], params["beta2"]), 0.0)
    return y2


if __name__ == "__main__":
    key = jax.random.PRNGKey(0)
    in_ch, out_ch = 4, 8
    n, h, w = 2, 16, 16
    ks = jax.random.split(key, 9)

    def uinit(k, shape, fan_in):
        bound = 1.0 / float(fan_in) ** 0.5
        return jax.random.uniform(k, shape, jnp.float32, -bound, bound)

    params = {
        "w1": uinit(ks[0], (out_ch, in_ch, 3, 3), in_ch * 9),
        "b1": uinit(ks[1], (out_ch,), in_ch * 9),
        "g1": 1.0 + 0.1 * jax.random.normal(ks[2], (out_ch,), jnp.float32),
        "beta1": 0.1 * jax.random.normal(ks[3], (out_ch,), jnp.float32),
        "w2": uinit(ks[4], (out_ch, out_ch, 3, 3), out_ch * 9),
        "b2": uinit(ks[5], (out_ch,), out_ch * 9),
        "g2": 1.0 + 0.1 * jax.random.normal(ks[6], (out_ch,), jnp.float32),
        "beta2": 0.1 * jax.random.normal(ks[7], (out_ch,), jnp.float32),
    }
    x = jax.random.normal(ks[8], (n, in_ch, h, w), jnp.float32)

    out = jax.block_until_ready(decoder_block(x, params))
    assert out.shape == (n, out_ch, h, w), out.shape

    # Precision-matched reference (bf16 GEMM inputs, f32 accumulation / BN).
    ref_bf16 = jax.block_until_ready(
        _ref_decoder_block(x, params, gemm_dtype=jnp.bfloat16))
    if not jnp.allclose(out, ref_bf16, rtol=1e-2, atol=1e-2):
        raise SystemExit("mismatch vs bf16-matched reference: max abs diff = %g"
                         % float(jnp.max(jnp.abs(out - ref_bf16))))

    # Full-f32 semantic reference (looser tolerance covers bf16 GEMM rounding).
    ref_f32 = jax.block_until_ready(_ref_decoder_block(x, params))
    if not jnp.allclose(out, ref_f32, rtol=5e-2, atol=5e-2):
        raise SystemExit("mismatch vs f32 reference: max abs diff = %g"
                         % float(jnp.max(jnp.abs(out - ref_f32))))

    print("KERNEL_OK")
</pallas_src>

<mosaic_0001>
module attributes {stable_mosaic.version = 11 : i64} {
  func.func @_conv_bias_stats_kernel(%arg0: i32, %arg1: memref<1x18x18x8xbf16, #tpu.memory_space<vmem>>, %arg2: memref<9x8x128xbf16, #tpu.memory_space<vmem>>, %arg3: memref<1x128xf32, #tpu.memory_space<vmem>>, %arg4: memref<1x16x16x128xf32, #tpu.memory_space<vmem>>, %arg5: memref<1x2x128xf32, #tpu.memory_space<vmem>>) attributes {dimension_semantics = [#tpu.dimension_semantics<parallel>], iteration_bounds = array<i64: 2>, scalar_prefetch = 0 : i64, scratch_operands = 0 : i64, tpu.core_type = #tpu.core_type<tc>, window_params = [{transform_indices = @transform_0, window_bounds = array<i64: 1, 18, 18, 8>}, {pipeline_mode = #tpu.pipeline_mode<synchronous>, transform_indices = @transform_1, window_bounds = array<i64: 9, 8, 128>}, {pipeline_mode = #tpu.pipeline_mode<synchronous>, transform_indices = @transform_2, window_bounds = array<i64: 1, 128>}, {transform_indices = @transform_3, window_bounds = array<i64: 1, 16, 16, 128>}, {transform_indices = @transform_4, window_bounds = array<i64: 1, 2, 128>}]} {
    %cst = arith.constant 0.000000e+00 : f32
    %0 = vector.broadcast %cst : f32 to vector<1x128xf32>
    %c0_i32 = arith.constant 0 : i32
    %c16_i32 = arith.constant 16 : i32
    %1 = arith.addi %c0_i32, %c16_i32 : i32
    %c1_i32 = arith.constant 1 : i32
    %2:2 = scf.for %arg6 = %c0_i32 to %1 step %c1_i32 iter_args(%arg7 = %0, %arg8 = %0) -> (vector<1x128xf32>, vector<1x128xf32>)  : i32 {
      %cst_5 = arith.constant 0.000000e+00 : f32
      %9 = vector.broadcast %cst_5 : f32 to vector<16x128xf32>
      %c0_i32_6 = arith.constant 0 : i32
      %10 = arith.addi %arg6, %c0_i32_6 : i32
      %c0_7 = arith.constant 0 : index
      %11 = arith.index_cast %10 : i32 to index
      %c0_8 = arith.constant 0 : index
      %c0_9 = arith.constant 0 : index
      %12 = vector.load %arg1[%c0_7, %11, %c0_8, %c0_9] : memref<1x18x18x8xbf16, #tpu.memory_space<vmem>>, vector<1x1x18x8xbf16>
      %13 = vector.shape_cast %12 : vector<1x1x18x8xbf16> to vector<18x8xbf16>
      %14 = vector.extract_strided_slice %13 {offsets = [0, 0], sizes = [16, 8], strides = [1, 1]} : vector<18x8xbf16> to vector<16x8xbf16>
      %c0_10 = arith.constant 0 : index
      %c0_11 = arith.constant 0 : index
      %c0_12 = arith.constant 0 : index
      %15 = vector.load %arg2[%c0_10, %c0_11, %c0_12] : memref<9x8x128xbf16, #tpu.memory_space<vmem>>, vector<1x8x128xbf16>
      %16 = vector.shape_cast %15 : vector<1x8x128xbf16> to vector<8x128xbf16>
      %cst_13 = arith.constant dense<0.000000e+00> : vector<16x128xf32>
      %17 = tpu.matmul %14, %16, %cst_13 {dimension_numbers = #tpu.dot_dimension_numbers<[1], [0], [0], [1], [0, 0, 1, 1], [], []>} : vector<16x8xbf16>, vector<8x128xbf16>, vector<16x128xf32> -> vector<16x128xf32>
      %18 = arith.addf %9, %17 : vector<16x128xf32>
      %19 = vector.extract_strided_slice %13 {offsets = [1, 0], sizes = [16, 8], strides = [1, 1]} : vector<18x8xbf16> to vector<16x8xbf16>
      %c1_14 = arith.constant 1 : index
      %c0_15 = arith.constant 0 : index
      %c0_16 = arith.constant 0 : index
      %20 = vector.load %arg2[%c1_14, %c0_15, %c0_16] : memref<9x8x128xbf16, #tpu.memory_space<vmem>>, vector<1x8x128xbf16>
      %21 = vector.shape_cast %20 : vector<1x8x128xbf16> to vector<8x128xbf16>
      %cst_17 = arith.constant dense<0.000000e+00> : vector<16x128xf32>
      %22 = tpu.matmul %19, %21, %cst_17 {dimension_numbers = #tpu.dot_dimension_numbers<[1], [0], [0], [1], [0, 0, 1, 1], [], []>} : vector<16x8xbf16>, vector<8x128xbf16>, vector<16x128xf32> -> vector<16x128xf32>
      %23 = arith.addf %18, %22 : vector<16x128xf32>
      %24 = vector.extract_strided_slice %13 {offsets = [2, 0], sizes = [16, 8], strides = [1, 1]} : vector<18x8xbf16> to vector<16x8xbf16>
      %c2 = arith.constant 2 : index
      %c0_18 = arith.constant 0 : index
      %c0_19 = arith.constant 0 : index
      %25 = vector.load %arg2[%c2, %c0_18, %c0_19] : memref<9x8x128xbf16, #tpu.memory_space<vmem>>, vector<1x8x128xbf16>
      %26 = vector.shape_cast %25 : vector<1x8x128xbf16> to vector<8x128xbf16>
      %cst_20 = arith.constant dense<0.000000e+00> : vector<16x128xf32>
      %27 = tpu.matmul %24, %26, %cst_20 {dimension_numbers = #tpu.dot_dimension_numbers<[1], [0], [0], [1], [0, 0, 1, 1], [], []>} : vector<16x8xbf16>, vector<8x128xbf16>, vector<16x128xf32> -> vector<16x128xf32>
      %28 = arith.addf %23, %27 : vector<16x128xf32>
      %c1_i32_21 = arith.constant 1 : i32
      %29 = arith.addi %arg6, %c1_i32_21 : i32
      %c0_22 = arith.constant 0 : index
      %30 = arith.index_cast %29 : i32 to index
      %c0_23 = arith.constant 0 : index
      %c0_24 = arith.constant 0 : index
      %31 = vector.load %arg1[%c0_22, %30, %c0_23, %c0_24] : memref<1x18x18x8xbf16, #tpu.memory_space<vmem>>, vector<1x1x18x8xbf16>
      %32 = vector.shape_cast %31 : vector<1x1x18x8xbf16> to vector<18x8xbf16>
      %33 = vector.extract_strided_slice %32 {offsets = [0, 0], sizes = [16, 8], strides = [1, 1]} : vector<18x8xbf16> to vector<16x8xbf16>
      %c3 = arith.constant 3 : index
      %c0_25 = arith.constant 0 : index
      %c0_26 = arith.constant 0 : index
      %34 = vector.load %arg2[%c3, %c0_25, %c0_26] : memref<9x8x128xbf16, #tpu.memory_space<vmem>>, vector<1x8x128xbf16>
      %35 = vector.shape_cast %34 : vector<1x8x128xbf16> to vector<8x128xbf16>
      %cst_27 = arith.constant dense<0.000000e+00> : vector<16x128xf32>
      %36 = tpu.matmul %33, %35, %cst_27 {dimension_numbers = #tpu.dot_dimension_numbers<[1], [0], [0], [1], [0, 0, 1, 1], [], []>} : vector<16x8xbf16>, vector<8x128xbf16>, vector<16x128xf32> -> vector<16x128xf32>
      %37 = arith.addf %28, %36 : vector<16x128xf32>
      %38 = vector.extract_strided_slice %32 {offsets = [1, 0], sizes = [16, 8], strides = [1, 1]} : vector<18x8xbf16> to vector<16x8xbf16>
      %c4 = arith.constant 4 : index
      %c0_28 = arith.constant 0 : index
      %c0_29 = arith.constant 0 : index
      %39 = vector.load %arg2[%c4, %c0_28, %c0_29] : memref<9x8x128xbf16, #tpu.memory_space<vmem>>, vector<1x8x128xbf16>
      %40 = vector.shape_cast %39 : vector<1x8x128xbf16> to vector<8x128xbf16>
      %cst_30 = arith.constant dense<0.000000e+00> : vector<16x128xf32>
      %41 = tpu.matmul %38, %40, %cst_30 {dimension_numbers = #tpu.dot_dimension_numbers<[1], [0], [0], [1], [0, 0, 1, 1], [], []>} : vector<16x8xbf16>, vector<8x128xbf16>, vector<16x128xf32> -> vector<16x128xf32>
      %42 = arith.addf %37, %41 : vector<16x128xf32>
      %43 = vector.extract_strided_slice %32 {offsets = [2, 0], sizes = [16, 8], strides = [1, 1]} : vector<18x8xbf16> to vector<16x8xbf16>
      %c5 = arith.constant 5 : index
      %c0_31 = arith.constant 0 : index
      %c0_32 = arith.constant 0 : index
      %44 = vector.load %arg2[%c5, %c0_31, %c0_32] : memref<9x8x128xbf16, #tpu.memory_space<vmem>>, vector<1x8x128xbf16>
      %45 = vector.shape_cast %44 : vector<1x8x128xbf16> to vector<8x128xbf16>
      %cst_33 = arith.constant dense<0.000000e+00> : vector<16x128xf32>
      %46 = tpu.matmul %43, %45, %cst_33 {dimension_numbers = #tpu.dot_dimension_numbers<[1], [0], [0], [1], [0, 0, 1, 1], [], []>} : vector<16x8xbf16>, vector<8x128xbf16>, vector<16x128xf32> -> vector<16x128xf32>
      %47 = arith.addf %42, %46 : vector<16x128xf32>
      %c2_i32 = arith.constant 2 : i32
      %48 = arith.addi %arg6, %c2_i32 : i32
      %c0_34 = arith.constant 0 : index
      %49 = arith.index_cast %48 : i32 to index
      %c0_35 = arith.constant 0 : index
      %c0_36 = arith.constant 0 : index
      %50 = vector.load %arg1[%c0_34, %49, %c0_35, %c0_36] : memref<1x18x18x8xbf16, #tpu.memory_space<vmem>>, vector<1x1x18x8xbf16>
      %51 = vector.shape_cast %50 : vector<1x1x18x8xbf16> to vector<18x8xbf16>
      %52 = vector.extract_strided_slice %51 {offsets = [0, 0], sizes = [16, 8], strides = [1, 1]} : vector<18x8xbf16> to vector<16x8xbf16>
      %c6 = arith.constant 6 : index
      %c0_37 = arith.constant 0 : index
      %c0_38 = arith.constant 0 : index
      %53 = vector.load %arg2[%c6, %c0_37, %c0_38] : memref<9x8x128xbf16, #tpu.memory_space<vmem>>, vector<1x8x128xbf16>
      %54 = vector.shape_cast %53 : vector<1x8x128xbf16> to vector<8x128xbf16>
      %cst_39 = arith.constant dense<0.000000e+00> : vector<16x128xf32>
      %55 = tpu.matmul %52, %54, %cst_39 {dimension_numbers = #tpu.dot_dimension_numbers<[1], [0], [0], [1], [0, 0, 1, 1], [], []>} : vector<16x8xbf16>, vector<8x128xbf16>, vector<16x128xf32> -> vector<16x128xf32>
      %56 = arith.addf %47, %55 : vector<16x128xf32>
      %57 = vector.extract_strided_slice %51 {offsets = [1, 0], sizes = [16, 8], strides = [1, 1]} : vector<18x8xbf16> to vector<16x8xbf16>
      %c7 = arith.constant 7 : index
      %c0_40 = arith.constant 0 : index
      %c0_41 = arith.constant 0 : index
      %58 = vector.load %arg2[%c7, %c0_40, %c0_41] : memref<9x8x128xbf16, #tpu.memory_space<vmem>>, vector<1x8x128xbf16>
      %59 = vector.shape_cast %58 : vector<1x8x128xbf16> to vector<8x128xbf16>
      %cst_42 = arith.constant dense<0.000000e+00> : vector<16x128xf32>
      %60 = tpu.matmul %57, %59, %cst_42 {dimension_numbers = #tpu.dot_dimension_numbers<[1], [0], [0], [1], [0, 0, 1, 1], [], []>} : vector<16x8xbf16>, vector<8x128xbf16>, vector<16x128xf32> -> vector<16x128xf32>
      %61 = arith.addf %56, %60 : vector<16x128xf32>
      %62 = vector.extract_strided_slice %51 {offsets = [2, 0], sizes = [16, 8], strides = [1, 1]} : vector<18x8xbf16> to vector<16x8xbf16>
      %c8 = arith.constant 8 : index
      %c0_43 = arith.constant 0 : index
      %c0_44 = arith.constant 0 : index
      %63 = vector.load %arg2[%c8, %c0_43, %c0_44] : memref<9x8x128xbf16, #tpu.memory_space<vmem>>, vector<1x8x128xbf16>
      %64 = vector.shape_cast %63 : vector<1x8x128xbf16> to vector<8x128xbf16>
      %cst_45 = arith.constant dense<0.000000e+00> : vector<16x128xf32>
      %65 = tpu.matmul %62, %64, %cst_45 {dimension_numbers = #tpu.dot_dimension_numbers<[1], [0], [0], [1], [0, 0, 1, 1], [], []>} : vector<16x8xbf16>, vector<8x128xbf16>, vector<16x128xf32> -> vector<16x128xf32>
      %66 = arith.addf %61, %65 : vector<16x128xf32>
      %c0_46 = arith.constant 0 : index
      %c0_47 = arith.constant 0 : index
      %67 = vector.load %arg3[%c0_46, %c0_47] : memref<1x128xf32, #tpu.memory_space<vmem>>, vector<1x128xf32>
      %68 = vector.broadcast %67 : vector<1x128xf32> to vector<16x128xf32>
      %69 = arith.addf %66, %68 : vector<16x128xf32>
      %c0_48 = arith.constant 0 : index
      %70 = arith.index_cast %arg6 : i32 to index
      %c0_49 = arith.constant 0 : index
      %c0_50 = arith.constant 0 : index
      %71 = vector.load %arg4[%c0_48, %70, %c0_49, %c0_50] : memref<1x16x16x128xf32, #tpu.memory_space<vmem>>, vector<1x1x16x128xf32>
      %72 = vector.shape_cast %71 : vector<1x1x16x128xf32> to vector<16x128xf32>
      %73 = vector.shape_cast %69 : vector<16x128xf32> to vector<1x1x16x128xf32>
      tpu.vector_store %arg4[%c0_48, %70, %c0_49, %c0_50], %73 {strides = array<i32>} : memref<1x16x16x128xf32, #tpu.memory_space<vmem>>, vector<1x1x16x128xf32>,
      %cst_51 = arith.constant dense<0.000000e+00> : vector<128xf32>
      %74 = vector.multi_reduction <add>, %69, %cst_51 [0] : vector<16x128xf32> to vector<128xf32>
      %75 = vector.shape_cast %74 : vector<128xf32> to vector<1x128xf32>
      %76 = arith.addf %arg7, %75 : vector<1x128xf32>
      %77 = arith.mulf %69, %69 : vector<16x128xf32>
      %cst_52 = arith.constant dense<0.000000e+00> : vector<128xf32>
      %78 = vector.multi_reduction <add>, %77, %cst_52 [0] : vector<16x128xf32> to vector<128xf32>
      %79 = vector.shape_cast %78 : vector<128xf32> to vector<1x128xf32>
      %80 = arith.addf %arg8, %79 : vector<1x128xf32>
      scf.yield %76, %80 : vector<1x128xf32>, vector<1x128xf32>
    }
    %c16_i32_0 = arith.constant 16 : i32
    %c0 = arith.constant 0 : index
    %c0_1 = arith.constant 0 : index
    %c0_2 = arith.constant 0 : index
    %3 = vector.load %arg5[%c0, %c0_1, %c0_2] : memref<1x2x128xf32, #tpu.memory_space<vmem>>, vector<1x1x128xf32>
    %4 = vector.shape_cast %3 : vector<1x1x128xf32> to vector<1x128xf32>
    %5 = vector.shape_cast %2#0 : vector<1x128xf32> to vector<1x1x128xf32>
    tpu.vector_store %arg5[%c0, %c0_1, %c0_2], %5 {strides = array<i32>} : memref<1x2x128xf32, #tpu.memory_space<vmem>>, vector<1x1x128xf32>,
    %c0_3 = arith.constant 0 : index
    %c1 = arith.constant 1 : index
    %c0_4 = arith.constant 0 : index
    %6 = vector.load %arg5[%c0_3, %c1, %c0_4] : memref<1x2x128xf32, #tpu.memory_space<vmem>>, vector<1x1x128xf32>
    %7 = vector.shape_cast %6 : vector<1x1x128xf32> to vector<1x128xf32>
    %8 = vector.shape_cast %2#1 : vector<1x128xf32> to vector<1x1x128xf32>
    tpu.vector_store %arg5[%c0_3, %c1, %c0_4], %8 {strides = array<i32>} : memref<1x2x128xf32, #tpu.memory_space<vmem>>, vector<1x1x128xf32>,
    return
  }
  func.func @transform_0(%arg0: i32) -> (i32, i32, i32, i32) {
    %c0_i32 = arith.constant 0 : i32
    %c0_i32_0 = arith.constant 0 : i32
    %c0_i32_1 = arith.constant 0 : i32
    %c0_i32_2 = arith.constant 0 : i32
    return %arg0, %c0_i32, %c0_i32_0, %c0_i32_1 : i32, i32, i32, i32
  }
  func.func @transform_1(%arg0: i32) -> (i32, i32, i32) {
    %c0_i32 = arith.constant 0 : i32
    %c0_i32_0 = arith.constant 0 : i32
    %c0_i32_1 = arith.constant 0 : i32
    %c0_i32_2 = arith.constant 0 : i32
    return %c0_i32, %c0_i32_0, %c0_i32_1 : i32, i32, i32
  }
  func.func @transform_2(%arg0: i32) -> (i32, i32) {
    %c0_i32 = arith.constant 0 : i32
    %c0_i32_0 = arith.constant 0 : i32
    %c0_i32_1 = arith.constant 0 : i32
    return %c0_i32, %c0_i32_0 : i32, i32
  }
  func.func @transform_3(%arg0: i32) -> (i32, i32, i32, i32) {
    %c0_i32 = arith.constant 0 : i32
    %c0_i32_0 = arith.constant 0 : i32
    %c0_i32_1 = arith.constant 0 : i32
    %c0_i32_2 = arith.constant 0 : i32
    return %arg0, %c0_i32, %c0_i32_0, %c0_i32_1 : i32, i32, i32, i32
  }
  func.func @transform_4(%arg0: i32) -> (i32, i32, i32) {
    %c0_i32 = arith.constant 0 : i32
    %c0_i32_0 = arith.constant 0 : i32
    %c0_i32_1 = arith.constant 0 : i32
    return %arg0, %c0_i32, %c0_i32_0 : i32, i32, i32
  }
}

module attributes {stable_mosaic.version = 11 : i64} {
  func.func @_bn_relu_kernel(%arg0: i32, %arg1: memref<512x128xf32, #tpu.memory_space<vmem>>, %arg2: memref<1x128xf32, #tpu.memory_space<vmem>>, %arg3: memref<1x128xf32, #tpu.memory_space<vmem>>, %arg4: memref<512x128xbf16, #tpu.memory_space<vmem>>) attributes {dimension_semantics = [#tpu.dimension_semantics<parallel>], iteration_bounds = array<i64: 1>, scalar_prefetch = 0 : i64, scratch_operands = 0 : i64, tpu.core_type = #tpu.core_type<tc>, window_params = [{transform_indices = @transform_0, window_bounds = array<i64: 512, 128>}, {pipeline_mode = #tpu.pipeline_mode<synchronous>, transform_indices = @transform_1, window_bounds = array<i64: 1, 128>}, {pipeline_mode = #tpu.pipeline_mode<synchronous>, transform_indices = @transform_2, window_bounds = array<i64: 1, 128>}, {transform_indices = @transform_3, window_bounds = array<i64: 512, 128>}]} {
    %c0 = arith.constant 0 : index
    %c0_0 = arith.constant 0 : index
    %0 = vector.load %arg1[%c0, %c0_0] : memref<512x128xf32, #tpu.memory_space<vmem>>, vector<512x128xf32>
    %c0_1 = arith.constant 0 : index
    %c0_2 = arith.constant 0 : index
    %1 = vector.load %arg2[%c0_1, %c0_2] : memref<1x128xf32, #tpu.memory_space<vmem>>, vector<1x128xf32>
    %2 = vector.broadcast %1 : vector<1x128xf32> to vector<512x128xf32>
    %3 = arith.mulf %0, %2 : vector<512x128xf32>
    %c0_3 = arith.constant 0 : index
    %c0_4 = arith.constant 0 : index
    %4 = vector.load %arg3[%c0_3, %c0_4] : memref<1x128xf32, #tpu.memory_space<vmem>>, vector<1x128xf32>
    %5 = vector.broadcast %4 : vector<1x128xf32> to vector<512x128xf32>
    %6 = arith.addf %3, %5 : vector<512x128xf32>
    %cst = arith.constant 0.000000e+00 : f32
    %7 = vector.broadcast %cst : f32 to vector<512x128xf32>
    %8 = arith.maximumf %6, %7 : vector<512x128xf32>
    %9 = arith.truncf %8 : vector<512x128xf32> to vector<512x128xbf16>
    %c0_5 = arith.constant 0 : index
    %c0_6 = arith.constant 0 : index
    %10 = vector.load %arg4[%c0_5, %c0_6] : memref<512x128xbf16, #tpu.memory_space<vmem>>, vector<512x128xbf16>
    tpu.vector_store %arg4[%c0_5, %c0_6], %9 {strides = array<i32>} : memref<512x128xbf16, #tpu.memory_space<vmem>>, vector<512x128xbf16>,
    return
  }
  func.func @transform_0(%arg0: i32) -> (i32, i32) {
    %c0_i32 = arith.constant 0 : i32
    %c0_i32_0 = arith.constant 0 : i32
    return %arg0, %c0_i32 : i32, i32
  }
  func.func @transform_1(%arg0: i32) -> (i32, i32) {
    %c0_i32 = arith.constant 0 : i32
    %c0_i32_0 = arith.constant 0 : i32
    %c0_i32_1 = arith.constant 0 : i32
    return %c0_i32, %c0_i32_0 : i32, i32
  }
  func.func @transform_2(%arg0: i32) -> (i32, i32) {
    %c0_i32 = arith.constant 0 : i32
    %c0_i32_0 = arith.constant 0 : i32
    %c0_i32_1 = arith.constant 0 : i32
    return %c0_i32, %c0_i32_0 : i32, i32
  }
  func.func @transform_3(%arg0: i32) -> (i32, i32) {
    %c0_i32 = arith.constant 0 : i32
    %c0_i32_0 = arith.constant 0 : i32
    return %arg0, %c0_i32 : i32, i32
  }
}

module attributes {stable_mosaic.version = 11 : i64} {
  func.func @_bn_relu_kernel(%arg0: i32, %arg1: memref<512x128xf32, #tpu.memory_space<vmem>>, %arg2: memref<1x128xf32, #tpu.memory_space<vmem>>, %arg3: memref<1x128xf32, #tpu.memory_space<vmem>>, %arg4: memref<512x128xf32, #tpu.memory_space<vmem>>) attributes {dimension_semantics = [#tpu.dimension_semantics<parallel>], iteration_bounds = array<i64: 1>, scalar_prefetch = 0 : i64, scratch_operands = 0 : i64, tpu.core_type = #tpu.core_type<tc>, window_params = [{transform_indices = @transform_0, window_bounds = array<i64: 512, 128>}, {pipeline_mode = #tpu.pipeline_mode<synchronous>, transform_indices = @transform_1, window_bounds = array<i64: 1, 128>}, {pipeline_mode = #tpu.pipeline_mode<synchronous>, transform_indices = @transform_2, window_bounds = array<i64: 1, 128>}, {transform_indices = @transform_3, window_bounds = array<i64: 512, 128>}]} {
    %c0 = arith.constant 0 : index
    %c0_0 = arith.constant 0 : index
    %0 = vector.load %arg1[%c0, %c0_0] : memref<512x128xf32, #tpu.memory_space<vmem>>, vector<512x128xf32>
    %c0_1 = arith.constant 0 : index
    %c0_2 = arith.constant 0 : index
    %1 = vector.load %arg2[%c0_1, %c0_2] : memref<1x128xf32, #tpu.memory_space<vmem>>, vector<1x128xf32>
    %2 = vector.broadcast %1 : vector<1x128xf32> to vector<512x128xf32>
    %3 = arith.mulf %0, %2 : vector<512x128xf32>
    %c0_3 = arith.constant 0 : index
    %c0_4 = arith.constant 0 : index
    %4 = vector.load %arg3[%c0_3, %c0_4] : memref<1x128xf32, #tpu.memory_space<vmem>>, vector<1x128xf32>
    %5 = vector.broadcast %4 : vector<1x128xf32> to vector<512x128xf32>
    %6 = arith.addf %3, %5 : vector<512x128xf32>
    %cst = arith.constant 0.000000e+00 : f32
    %7 = vector.broadcast %cst : f32 to vector<512x128xf32>
    %8 = arith.maximumf %6, %7 : vector<512x128xf32>
    %c0_5 = arith.constant 0 : index
    %c0_6 = arith.constant 0 : index
    %9 = vector.load %arg4[%c0_5, %c0_6] : memref<512x128xf32, #tpu.memory_space<vmem>>, vector<512x128xf32>
    tpu.vector_store %arg4[%c0_5, %c0_6], %8 {strides = array<i32>} : memref<512x128xf32, #tpu.memory_space<vmem>>, vector<512x128xf32>,
    return
  }
  func.func @transform_0(%arg0: i32) -> (i32, i32) {
    %c0_i32 = arith.constant 0 : i32
    %c0_i32_0 = arith.constant 0 : i32
    return %arg0, %c0_i32 : i32, i32
  }
  func.func @transform_1(%arg0: i32) -> (i32, i32) {
    %c0_i32 = arith.constant 0 : i32
    %c0_i32_0 = arith.constant 0 : i32
    %c0_i32_1 = arith.constant 0 : i32
    return %c0_i32, %c0_i32_0 : i32, i32
  }
  func.func @transform_2(%arg0: i32) -> (i32, i32) {
    %c0_i32 = arith.constant 0 : i32
    %c0_i32_0 = arith.constant 0 : i32
    %c0_i32_1 = arith.constant 0 : i32
    return %c0_i32, %c0_i32_0 : i32, i32
  }
  func.func @transform_3(%arg0: i32) -> (i32, i32) {
    %c0_i32 = arith.constant 0 : i32
    %c0_i32_0 = arith.constant 0 : i32
    return %arg0, %c0_i32 : i32, i32
  }
}

module attributes {stable_mosaic.version = 11 : i64} {
  func.func @_conv_bias_stats_kernel(%arg0: i32, %arg1: memref<1x18x18x128xbf16, #tpu.memory_space<vmem>>, %arg2: memref<9x128x128xbf16, #tpu.memory_space<vmem>>, %arg3: memref<1x128xf32, #tpu.memory_space<vmem>>, %arg4: memref<1x16x16x128xf32, #tpu.memory_space<vmem>>, %arg5: memref<1x2x128xf32, #tpu.memory_space<vmem>>) attributes {dimension_semantics = [#tpu.dimension_semantics<parallel>], iteration_bounds = array<i64: 2>, scalar_prefetch = 0 : i64, scratch_operands = 0 : i64, tpu.core_type = #tpu.core_type<tc>, window_params = [{transform_indices = @transform_0, window_bounds = array<i64: 1, 18, 18, 128>}, {pipeline_mode = #tpu.pipeline_mode<synchronous>, transform_indices = @transform_1, window_bounds = array<i64: 9, 128, 128>}, {pipeline_mode = #tpu.pipeline_mode<synchronous>, transform_indices = @transform_2, window_bounds = array<i64: 1, 128>}, {transform_indices = @transform_3, window_bounds = array<i64: 1, 16, 16, 128>}, {transform_indices = @transform_4, window_bounds = array<i64: 1, 2, 128>}]} {
    %cst = arith.constant 0.000000e+00 : f32
    %0 = vector.broadcast %cst : f32 to vector<1x128xf32>
    %c0_i32 = arith.constant 0 : i32
    %c16_i32 = arith.constant 16 : i32
    %1 = arith.addi %c0_i32, %c16_i32 : i32
    %c1_i32 = arith.constant 1 : i32
    %2:2 = scf.for %arg6 = %c0_i32 to %1 step %c1_i32 iter_args(%arg7 = %0, %arg8 = %0) -> (vector<1x128xf32>, vector<1x128xf32>)  : i32 {
      %cst_5 = arith.constant 0.000000e+00 : f32
      %9 = vector.broadcast %cst_5 : f32 to vector<16x128xf32>
      %c0_i32_6 = arith.constant 0 : i32
      %10 = arith.addi %arg6, %c0_i32_6 : i32
      %c0_7 = arith.constant 0 : index
      %11 = arith.index_cast %10 : i32 to index
      %c0_8 = arith.constant 0 : index
      %c0_9 = arith.constant 0 : index
      %12 = vector.load %arg1[%c0_7, %11, %c0_8, %c0_9] : memref<1x18x18x128xbf16, #tpu.memory_space<vmem>>, vector<1x1x18x128xbf16>
      %13 = vector.shape_cast %12 : vector<1x1x18x128xbf16> to vector<18x128xbf16>
      %14 = vector.extract_strided_slice %13 {offsets = [0, 0], sizes = [16, 128], strides = [1, 1]} : vector<18x128xbf16> to vector<16x128xbf16>
      %c0_10 = arith.constant 0 : index
      %c0_11 = arith.constant 0 : index
      %c0_12 = arith.constant 0 : index
      %15 = vector.load %arg2[%c0_10, %c0_11, %c0_12] : memref<9x128x128xbf16, #tpu.memory_space<vmem>>, vector<1x128x128xbf16>
      %16 = vector.shape_cast %15 : vector<1x128x128xbf16> to vector<128x128xbf16>
      %cst_13 = arith.constant dense<0.000000e+00> : vector<16x128xf32>
      %17 = tpu.matmul %14, %16, %cst_13 {dimension_numbers = #tpu.dot_dimension_numbers<[1], [0], [0], [1], [0, 0, 1, 1], [], []>} : vector<16x128xbf16>, vector<128x128xbf16>, vector<16x128xf32> -> vector<16x128xf32>
      %18 = arith.addf %9, %17 : vector<16x128xf32>
      %19 = vector.extract_strided_slice %13 {offsets = [1, 0], sizes = [16, 128], strides = [1, 1]} : vector<18x128xbf16> to vector<16x128xbf16>
      %c1_14 = arith.constant 1 : index
      %c0_15 = arith.constant 0 : index
      %c0_16 = arith.constant 0 : index
      %20 = vector.load %arg2[%c1_14, %c0_15, %c0_16] : memref<9x128x128xbf16, #tpu.memory_space<vmem>>, vector<1x128x128xbf16>
      %21 = vector.shape_cast %20 : vector<1x128x128xbf16> to vector<128x128xbf16>
      %cst_17 = arith.constant dense<0.000000e+00> : vector<16x128xf32>
      %22 = tpu.matmul %19, %21, %cst_17 {dimension_numbers = #tpu.dot_dimension_numbers<[1], [0], [0], [1], [0, 0, 1, 1], [], []>} : vector<16x128xbf16>, vector<128x128xbf16>, vector<16x128xf32> -> vector<16x128xf32>
      %23 = arith.addf %18, %22 : vector<16x128xf32>
      %24 = vector.extract_strided_slice %13 {offsets = [2, 0], sizes = [16, 128], strides = [1, 1]} : vector<18x128xbf16> to vector<16x128xbf16>
      %c2 = arith.constant 2 : index
      %c0_18 = arith.constant 0 : index
      %c0_19 = arith.constant 0 : index
      %25 = vector.load %arg2[%c2, %c0_18, %c0_19] : memref<9x128x128xbf16, #tpu.memory_space<vmem>>, vector<1x128x128xbf16>
      %26 = vector.shape_cast %25 : vector<1x128x128xbf16> to vector<128x128xbf16>
      %cst_20 = arith.constant dense<0.000000e+00> : vector<16x128xf32>
      %27 = tpu.matmul %24, %26, %cst_20 {dimension_numbers = #tpu.dot_dimension_numbers<[1], [0], [0], [1], [0, 0, 1, 1], [], []>} : vector<16x128xbf16>, vector<128x128xbf16>, vector<16x128xf32> -> vector<16x128xf32>
      %28 = arith.addf %23, %27 : vector<16x128xf32>
      %c1_i32_21 = arith.constant 1 : i32
      %29 = arith.addi %arg6, %c1_i32_21 : i32
      %c0_22 = arith.constant 0 : index
      %30 = arith.index_cast %29 : i32 to index
      %c0_23 = arith.constant 0 : index
      %c0_24 = arith.constant 0 : index
      %31 = vector.load %arg1[%c0_22, %30, %c0_23, %c0_24] : memref<1x18x18x128xbf16, #tpu.memory_space<vmem>>, vector<1x1x18x128xbf16>
      %32 = vector.shape_cast %31 : vector<1x1x18x128xbf16> to vector<18x128xbf16>
      %33 = vector.extract_strided_slice %32 {offsets = [0, 0], sizes = [16, 128], strides = [1, 1]} : vector<18x128xbf16> to vector<16x128xbf16>
      %c3 = arith.constant 3 : index
      %c0_25 = arith.constant 0 : index
      %c0_26 = arith.constant 0 : index
      %34 = vector.load %arg2[%c3, %c0_25, %c0_26] : memref<9x128x128xbf16, #tpu.memory_space<vmem>>, vector<1x128x128xbf16>
      %35 = vector.shape_cast %34 : vector<1x128x128xbf16> to vector<128x128xbf16>
      %cst_27 = arith.constant dense<0.000000e+00> : vector<16x128xf32>
      %36 = tpu.matmul %33, %35, %cst_27 {dimension_numbers = #tpu.dot_dimension_numbers<[1], [0], [0], [1], [0, 0, 1, 1], [], []>} : vector<16x128xbf16>, vector<128x128xbf16>, vector<16x128xf32> -> vector<16x128xf32>
      %37 = arith.addf %28, %36 : vector<16x128xf32>
      %38 = vector.extract_strided_slice %32 {offsets = [1, 0], sizes = [16, 128], strides = [1, 1]} : vector<18x128xbf16> to vector<16x128xbf16>
      %c4 = arith.constant 4 : index
      %c0_28 = arith.constant 0 : index
      %c0_29 = arith.constant 0 : index
      %39 = vector.load %arg2[%c4, %c0_28, %c0_29] : memref<9x128x128xbf16, #tpu.memory_space<vmem>>, vector<1x128x128xbf16>
      %40 = vector.shape_cast %39 : vector<1x128x128xbf16> to vector<128x128xbf16>
      %cst_30 = arith.constant dense<0.000000e+00> : vector<16x128xf32>
      %41 = tpu.matmul %38, %40, %cst_30 {dimension_numbers = #tpu.dot_dimension_numbers<[1], [0], [0], [1], [0, 0, 1, 1], [], []>} : vector<16x128xbf16>, vector<128x128xbf16>, vector<16x128xf32> -> vector<16x128xf32>
      %42 = arith.addf %37, %41 : vector<16x128xf32>
      %43 = vector.extract_strided_slice %32 {offsets = [2, 0], sizes = [16, 128], strides = [1, 1]} : vector<18x128xbf16> to vector<16x128xbf16>
      %c5 = arith.constant 5 : index
      %c0_31 = arith.constant 0 : index
      %c0_32 = arith.constant 0 : index
      %44 = vector.load %arg2[%c5, %c0_31, %c0_32] : memref<9x128x128xbf16, #tpu.memory_space<vmem>>, vector<1x128x128xbf16>
      %45 = vector.shape_cast %44 : vector<1x128x128xbf16> to vector<128x128xbf16>
      %cst_33 = arith.constant dense<0.000000e+00> : vector<16x128xf32>
      %46 = tpu.matmul %43, %45, %cst_33 {dimension_numbers = #tpu.dot_dimension_numbers<[1], [0], [0], [1], [0, 0, 1, 1], [], []>} : vector<16x128xbf16>, vector<128x128xbf16>, vector<16x128xf32> -> vector<16x128xf32>
      %47 = arith.addf %42, %46 : vector<16x128xf32>
      %c2_i32 = arith.constant 2 : i32
      %48 = arith.addi %arg6, %c2_i32 : i32
      %c0_34 = arith.constant 0 : index
      %49 = arith.index_cast %48 : i32 to index
      %c0_35 = arith.constant 0 : index
      %c0_36 = arith.constant 0 : index
      %50 = vector.load %arg1[%c0_34, %49, %c0_35, %c0_36] : memref<1x18x18x128xbf16, #tpu.memory_space<vmem>>, vector<1x1x18x128xbf16>
      %51 = vector.shape_cast %50 : vector<1x1x18x128xbf16> to vector<18x128xbf16>
      %52 = vector.extract_strided_slice %51 {offsets = [0, 0], sizes = [16, 128], strides = [1, 1]} : vector<18x128xbf16> to vector<16x128xbf16>
      %c6 = arith.constant 6 : index
      %c0_37 = arith.constant 0 : index
      %c0_38 = arith.constant 0 : index
      %53 = vector.load %arg2[%c6, %c0_37, %c0_38] : memref<9x128x128xbf16, #tpu.memory_space<vmem>>, vector<1x128x128xbf16>
      %54 = vector.shape_cast %53 : vector<1x128x128xbf16> to vector<128x128xbf16>
      %cst_39 = arith.constant dense<0.000000e+00> : vector<16x128xf32>
      %55 = tpu.matmul %52, %54, %cst_39 {dimension_numbers = #tpu.dot_dimension_numbers<[1], [0], [0], [1], [0, 0, 1, 1], [], []>} : vector<16x128xbf16>, vector<128x128xbf16>, vector<16x128xf32> -> vector<16x128xf32>
      %56 = arith.addf %47, %55 : vector<16x128xf32>
      %57 = vector.extract_strided_slice %51 {offsets = [1, 0], sizes = [16, 128], strides = [1, 1]} : vector<18x128xbf16> to vector<16x128xbf16>
      %c7 = arith.constant 7 : index
      %c0_40 = arith.constant 0 : index
      %c0_41 = arith.constant 0 : index
      %58 = vector.load %arg2[%c7, %c0_40, %c0_41] : memref<9x128x128xbf16, #tpu.memory_space<vmem>>, vector<1x128x128xbf16>
      %59 = vector.shape_cast %58 : vector<1x128x128xbf16> to vector<128x128xbf16>
      %cst_42 = arith.constant dense<0.000000e+00> : vector<16x128xf32>
      %60 = tpu.matmul %57, %59, %cst_42 {dimension_numbers = #tpu.dot_dimension_numbers<[1], [0], [0], [1], [0, 0, 1, 1], [], []>} : vector<16x128xbf16>, vector<128x128xbf16>, vector<16x128xf32> -> vector<16x128xf32>
      %61 = arith.addf %56, %60 : vector<16x128xf32>
      %62 = vector.extract_strided_slice %51 {offsets = [2, 0], sizes = [16, 128], strides = [1, 1]} : vector<18x128xbf16> to vector<16x128xbf16>
      %c8 = arith.constant 8 : index
      %c0_43 = arith.constant 0 : index
      %c0_44 = arith.constant 0 : index
      %63 = vector.load %arg2[%c8, %c0_43, %c0_44] : memref<9x128x128xbf16, #tpu.memory_space<vmem>>, vector<1x128x128xbf16>
      %64 = vector.shape_cast %63 : vector<1x128x128xbf16> to vector<128x128xbf16>
      %cst_45 = arith.constant dense<0.000000e+00> : vector<16x128xf32>
      %65 = tpu.matmul %62, %64, %cst_45 {dimension_numbers = #tpu.dot_dimension_numbers<[1], [0], [0], [1], [0, 0, 1, 1], [], []>} : vector<16x128xbf16>, vector<128x128xbf16>, vector<16x128xf32> -> vector<16x128xf32>
      %66 = arith.addf %61, %65 : vector<16x128xf32>
      %c0_46 = arith.constant 0 : index
      %c0_47 = arith.constant 0 : index
      %67 = vector.load %arg3[%c0_46, %c0_47] : memref<1x128xf32, #tpu.memory_space<vmem>>, vector<1x128xf32>
      %68 = vector.broadcast %67 : vector<1x128xf32> to vector<16x128xf32>
      %69 = arith.addf %66, %68 : vector<16x128xf32>
      %c0_48 = arith.constant 0 : index
      %70 = arith.index_cast %arg6 : i32 to index
      %c0_49 = arith.constant 0 : index
      %c0_50 = arith.constant 0 : index
      %71 = vector.load %arg4[%c0_48, %70, %c0_49, %c0_50] : memref<1x16x16x128xf32, #tpu.memory_space<vmem>>, vector<1x1x16x128xf32>
      %72 = vector.shape_cast %71 : vector<1x1x16x128xf32> to vector<16x128xf32>
      %73 = vector.shape_cast %69 : vector<16x128xf32> to vector<1x1x16x128xf32>
      tpu.vector_store %arg4[%c0_48, %70, %c0_49, %c0_50], %73 {strides = array<i32>} : memref<1x16x16x128xf32, #tpu.memory_space<vmem>>, vector<1x1x16x128xf32>,
      %cst_51 = arith.constant dense<0.000000e+00> : vector<128xf32>
      %74 = vector.multi_reduction <add>, %69, %cst_51 [0] : vector<16x128xf32> to vector<128xf32>
      %75 = vector.shape_cast %74 : vector<128xf32> to vector<1x128xf32>
      %76 = arith.addf %arg7, %75 : vector<1x128xf32>
      %77 = arith.mulf %69, %69 : vector<16x128xf32>
      %cst_52 = arith.constant dense<0.000000e+00> : vector<128xf32>
      %78 = vector.multi_reduction <add>, %77, %cst_52 [0] : vector<16x128xf32> to vector<128xf32>
      %79 = vector.shape_cast %78 : vector<128xf32> to vector<1x128xf32>
      %80 = arith.addf %arg8, %79 : vector<1x128xf32>
      scf.yield %76, %80 : vector<1x128xf32>, vector<1x128xf32>
    }
    %c16_i32_0 = arith.constant 16 : i32
    %c0 = arith.constant 0 : index
    %c0_1 = arith.constant 0 : index
    %c0_2 = arith.constant 0 : index
    %3 = vector.load %arg5[%c0, %c0_1, %c0_2] : memref<1x2x128xf32, #tpu.memory_space<vmem>>, vector<1x1x128xf32>
    %4 = vector.shape_cast %3 : vector<1x1x128xf32> to vector<1x128xf32>
    %5 = vector.shape_cast %2#0 : vector<1x128xf32> to vector<1x1x128xf32>
    tpu.vector_store %arg5[%c0, %c0_1, %c0_2], %5 {strides = array<i32>} : memref<1x2x128xf32, #tpu.memory_space<vmem>>, vector<1x1x128xf32>,
    %c0_3 = arith.constant 0 : index
    %c1 = arith.constant 1 : index
    %c0_4 = arith.constant 0 : index
    %6 = vector.load %arg5[%c0_3, %c1, %c0_4] : memref<1x2x128xf32, #tpu.memory_space<vmem>>, vector<1x1x128xf32>
    %7 = vector.shape_cast %6 : vector<1x1x128xf32> to vector<1x128xf32>
    %8 = vector.shape_cast %2#1 : vector<1x128xf32> to vector<1x1x128xf32>
    tpu.vector_store %arg5[%c0_3, %c1, %c0_4], %8 {strides = array<i32>} : memref<1x2x128xf32, #tpu.memory_space<vmem>>, vector<1x1x128xf32>,
    return
  }
  func.func @transform_0(%arg0: i32) -> (i32, i32, i32, i32) {
    %c0_i32 = arith.constant 0 : i32
    %c0_i32_0 = arith.constant 0 : i32
    %c0_i32_1 = arith.constant 0 : i32
    %c0_i32_2 = arith.constant 0 : i32
    return %arg0, %c0_i32, %c0_i32_0, %c0_i32_1 : i32, i32, i32, i32
  }
  func.func @transform_1(%arg0: i32) -> (i32, i32, i32) {
    %c0_i32 = arith.constant 0 : i32
    %c0_i32_0 = arith.constant 0 : i32
    %c0_i32_1 = arith.constant 0 : i32
    %c0_i32_2 = arith.constant 0 : i32
    return %c0_i32, %c0_i32_0, %c0_i32_1 : i32, i32, i32
  }
  func.func @transform_2(%arg0: i32) -> (i32, i32) {
    %c0_i32 = arith.constant 0 : i32
    %c0_i32_0 = arith.constant 0 : i32
    %c0_i32_1 = arith.constant 0 : i32
    return %c0_i32, %c0_i32_0 : i32, i32
  }
  func.func @transform_3(%arg0: i32) -> (i32, i32, i32, i32) {
    %c0_i32 = arith.constant 0 : i32
    %c0_i32_0 = arith.constant 0 : i32
    %c0_i32_1 = arith.constant 0 : i32
    %c0_i32_2 = arith.constant 0 : i32
    return %arg0, %c0_i32, %c0_i32_0, %c0_i32_1 : i32, i32, i32, i32
  }
  func.func @transform_4(%arg0: i32) -> (i32, i32, i32) {
    %c0_i32 = arith.constant 0 : i32
    %c0_i32_0 = arith.constant 0 : i32
    %c0_i32_1 = arith.constant 0 : i32
    return %arg0, %c0_i32, %c0_i32_0 : i32, i32, i32
  }
}

</mosaic_0001>

<bundles_post_ra>
// kernel: decoder_block.4
= control target key start
LH: loop header
LB: loop body
LE: loop exit
PB: predicated region body
PF: predicated region fallthrough
CT: control target
= control target key end

     0   :  { %s800_s15 = smov 0   ;;  %s910_s0 = inlined_call_operand.vmem [shape: bf16[2,18,18,8], index: 0, kind: input, shape index: {}]   ;;  %s911_s1 = inlined_call_operand.vmem [shape: bf16[9,8,128], index: 1, kind: input, shape index: {}]   ;;  %s912_s2 = inlined_call_operand.vmem [shape: f32[1,128], index: 2, kind: input, shape index: {}]   ;;  %s913_s3 = inlined_call_operand.vmem [shape: f32[2,16,16,128], index: 3, kind: output, shape index: {0}]   ;;  %s914_s4 = inlined_call_operand.vmem [shape: f32[2,2,128], index: 4, kind: output, shape index: {1}]  }
   0x1 LB: > { %s656_s16 = sadd.s32 4294967295, %s761_s15   ;;  %p660_p0 = scmp.ge.s32.totalorder %s761_s15, 1  ;;  %s761_s15 = sphi %s800_s15, %s15_s15  }
   0x2   : > { %p165_p1 = scmp.lt.s32.totalorder %s761_s15, 3 }
   0x4   : > { %p166_p2 = pnand %p660_p0, %p165_p1 }
   0x5   : > { %p195_p3 = scmp.lt.s32.totalorder (!%p166_p2), %s656_s16, 1  ;;  %s827_s29 = smov (!%p166_p2), 0  }
   0x6   : > { %169 = sbr.rel (%p166_p2) target bundleno = 218 (0xda), region = 32 }
   0xb   : > { %s918_s16 = smov (!%p195_p3, %s656_s16), 1  ;;  %v823_v0 = vmov 0.0   ;;  %v825_v1 = vmov 0.0  }
   0xc   : > { %s709_s17 = smul.u32 216, %s918_s16  ;;  %s704_s18 = sshll.u32 %s918_s16, 8 }
   0xd   : > { %s811_s21 = scalar_lea.vmem %s913_s3, %s704_s18  ;;  %s664_s22 = sshll.u32 %s918_s16, 1 }
   0xe   : > { %s816_s25 = scalar_lea.vmem %s910_s0, %s709_s17  ;;  %s821_s28 = scalar_lea.vmem %s914_s4, %s664_s22 }
   0xf LB: >> { %vm252_vm0 = vcmask 1043456   ;;  %v673_v2 = vld [vmem:[%s911_s1 + $0x8] sm:$0xf]  ;;  %v666_v3 = vld [vmem:[%s911_s1 + $0x4] sm:$0xf]  ;;  %s705_s12 = smul.u32 12, %s773_s29  ;;  %s773_s29 = sphi %s827_s29, %s215_s29   ;;  %v769_v1 = vphi %v825_v1, %v916_v1   ;;  %v765_v0 = vphi %v823_v0, %v915_v0  }
  0x10   : >> { %v299_v4 = vsel %vm252_vm0, %v673_v2, 0  ;;  %v254_v5 = vsel %vm252_vm0, %v666_v3, 0  ;;  %v224_v6 = vld [vmem:[%s911_s1] sm:$0xf]  ;;  %v678_v7 = vld [vmem:[%s911_s1 + $0xc] sm:$0xf] }
  0x11   : >> { %308 = vmatpush.bf16.msra.mxu2 %v299_v4  ;;  %263 = vmatpush.bf16.msra.mxu0 %v254_v5  ;;  %v273_v8 = vsel %vm252_vm0, %v224_v6, 0  ;;  %v335_v9 = vsel %vm252_vm0, %v678_v7, 0  ;;  %v684_v10 = vld [vmem:[%s911_s1 + $0x10] sm:$0xf]  ;;  %v691_v11 = vld [vmem:[%s911_s1 + $0x18] sm:$0xf]  ;;  %s220_s20 = scalar_lea.vmem %s816_s25, %s705_s12 }
  0x12   : >> { %282 = vmatpush.bf16.msra.mxu1 %v273_v8  ;;  %344 = vmatpush.bf16.msra.mxu3 %v335_v9  ;;  %v697_v12 = vld [vmem:[%s911_s1 + $0x1c] sm:$0xf]  ;;  %v373_v13 = vsel %vm252_vm0, %v684_v10, 0  ;;  %v436_v14 = vsel %vm252_vm0, %v691_v11, 0  ;;  %v686_v16 = vld [vmem:[%s911_s1 + $0x14] sm:$0xf] }
  0x13   : >> { %v474_v15 = vsel %vm252_vm0, %v697_v12, 0  ;;  %v706_v17 = vld [vmem:[%s220_s20] sm:$0xff]  ;;  %v223_v18 = vld [vmem:[%s220_s20 + $0x8] sm:$0x1]  ;;  %v707_v19 = vld [vmem:[%s220_s20 + $0xc] sm:$0xff]  ;;  %v400_v20 = vsel %vm252_vm0, %v686_v16, 0 }
  0x14   : >> { %v232_v21 = vunpack.c.l.b16 %v223_v18  ;;  %vm248_vm1 = vcmask 64512   ;;  %v708_v22 = vld [vmem:[%s220_s20 + $0x18] sm:$0xff]  ;;  %v690_v23 = vld [vmem:[%s220_s20 + $0x20] sm:$0x1]  ;;  %v237_v24 = vshrl.u32 %v706_v17, 16  ;;  %v239_v25 = vshll.u32 %v706_v17, 16 }
  0x15   : >> { %382 = vmatpush.bf16.msrb.mxu0 %v373_v13  ;;  %445 = vmatpush.bf16.msrb.mxu2 %v436_v14  ;;  %v677_v26 = vld [vmem:[%s220_s20 + $0x14] sm:$0x1]  ;;  %v292_v28 = vrot.slane %v706_v17, 1  ;;  %v457_v29 = vunpack.c.l.b16 %v690_v23  ;;  %vm291_vm2 = vcmask 1046528   ;;  %v461_v31 = vshll.u32 %v708_v22, 16  ;;  %s701_s5 = sshll.u32 %s773_s29, 4 }
  0x16   : >> { %483 = vmatpush.bf16.msrb.mxu3 %v474_v15  ;;  %409 = vmatpush.bf16.msrb.mxu1 %v400_v20  ;;  %v234_v27 = vpack.c.b16 %v232_v21, %v232_v21  ;;  %v241_v30 = vrot.slane %v239_v25, 1  ;;  %v356_v34 = vunpack.c.l.b16 %v677_v26  ;;  %v699_v36 = vld [vmem:[%s911_s1 + $0x20] sm:$0xf]  ;;  %vm235_vm3 = vsmask.f32 7424  ;;  %s526_s6 = scalar_lea.vmem %s811_s21, %s701_s5  ;;  %s215_s29 = sadd.s32 1, %s773_s29  }
  0x17   : >> { %672 = vmatmul.msk.bf16.vlgmr.msra.gmra.mxu1 %vm248_vm1, %v706_v17  ;;  %683 = vmatmul.msk.bf16.vlgmr.msra.gmra.mxu3 %vm248_vm1, %v707_v19  ;;  %v458_v35 = vpack.c.b16 %v457_v29, %v457_v29  ;;  %v459_v38 = vshrl.u32 %v708_v22, 16  ;;  %v463_v41 = vrot.slane %v461_v31, 1  ;;  %v501_v43 = vsel %vm252_vm0, %v699_v36, 0  ;;  %v742_v26 = vld [vmem:[%s912_s2] ss:$0 sm:$0xff]  ;;  %p212_p4 = scmp.ge.s32.totalorder %s215_s29, 16  }
  0x18   : >> { %v293_v32 = vrot.slane %v234_v27, 1  ;;  %v244_v33 = vshll.u32 %v234_v27, 16  ;;  %v242_v37 = vor.u32 %v241_v30, %v237_v24  ;;  %v357_v45 = vpack.c.b16 %v356_v34, %v356_v34 }
  0x19   : >> { %v466_v42 = vshll.u32 %v458_v35, 16  ;;  %v360_v46 = vshll.u32 %v707_v19, 16  ;;  %v464_v47 = vor.u32 %v463_v41, %v459_v38  ;;  %v393_v49 = vrot.slane %v707_v19, 1 }
  0x1a   : >> { %v294_v39 = vsel %vm291_vm2, %v292_v28, %v293_v32  ;;  %v246_v40 = vrot.slane %v244_v33, 1  ;;  %v394_v50 = vrot.slane %v357_v45, 1  ;;  %v358_v51 = vshrl.u32 %v707_v19, 16 }
  0x1b   : >> { %674 = vmatmul.msk.bf16.vlgmr.msra.gmra.mxu2 %vm248_vm1, %v294_v39  ;;  %v468_v48 = vrot.slane %v466_v42, 1  ;;  %v362_v52 = vrot.slane %v360_v46, 1  ;;  %v365_v53 = vshll.u32 %v357_v45, 16  ;;  %v494_v59 = vrot.slane %v708_v22, 1 }
  0x1c   : >> { %v247_v44 = vsel %vm235_vm3, %v242_v37, %v246_v40  ;;  %v395_v55 = vsel %vm291_vm2, %v393_v49, %v394_v50  ;;  %v495_v60 = vrot.slane %v458_v35, 1 }
  0x1d   : >> { %671 = vmatmul.msk.bf16.vlgmr.msra.gmra.mxu0 %vm248_vm1, %v247_v44  ;;  %v469_v54 = vsel %vm235_vm3, %v464_v47, %v468_v48  ;;  %v363_v56 = vor.u32 %v362_v52, %v358_v51  ;;  %v367_v57 = vrot.slane %v365_v53, 1 }
  0x1e   : >> { %510 = vmatpush.bf16.msra.mxu0 %v501_v43  ;;  %v496_v61 = vsel %vm291_vm2, %v494_v59, %v495_v60 }
  0x1f   : >> { %v368_v58 = vsel %vm235_vm3, %v363_v56, %v367_v57 }
  0x27   : >> { %698 = vmatmul.msk.bf16.vlgmr.msrb.gmra.mxu3 %vm248_vm1, %v469_v54  ;;  %687 = vmatmul.msk.bf16.vlgmr.msrb.gmra.mxu1 %vm248_vm1, %v395_v55 }
  0x2b   : >> { %696 = vmatmul.msk.bf16.vlgmr.msrb.gmra.mxu2 %vm248_vm1, %v708_v22 }
  0x2d   : >> { %685 = vmatmul.msk.bf16.vlgmr.msrb.gmra.mxu0 %vm248_vm1, %v368_v58 }
  0x3d   : >> { %700 = vmatmul.msk.bf16.vlgmr.msra.gmra.mxu0 %vm248_vm1, %v496_v61 }
  0x94   : >> { %v284_v63 = vpop.f32.mrf.mxu1 }
  0x9a   : >> { %v265_v62 = vpop.f32.mrf.mxu0  ;;  %v346_v3 = vpop.f32.mrf.mxu3 }
  0x9b   : >> { %v285_v6 = vadd.f32 %v284_v63, %v265_v62 }
  0x9c   : >> { %v286_v5 = vpop.f32.mrf.mxu1 }
  0x9e   : >> { %v310_v2 = vpop.f32.mrf.mxu2 }
  0x9f   : >> { %v315_v8 = vadd.f32 %v310_v2, %v285_v6 }
  0xa1   : >> { %v351_v11 = vadd.f32 %v346_v3, %v315_v8 }
  0xa2   : >> { %v267_v4 = vpop.f32.mrf.mxu0  ;;  %v348_v9 = vpop.f32.mrf.mxu3 }
  0xa3   : >> { %v287_v13 = vadd.f32 %v286_v5, %v267_v4 }
  0xa4   : >> { %v411_v12 = vpop.f32.mrf.mxu1 }
  0xa6   : >> { %v312_v7 = vpop.f32.mrf.mxu2 }
  0xa7   : >> { %v316_v15 = vadd.f32 %v312_v7, %v287_v13 }
  0xa9   : >> { %v352_v19 = vadd.f32 %v348_v9, %v316_v15 }
  0xaa   : >> { %v384_v10 = vpop.f32.mrf.mxu0  ;;  %v485_v20 = vpop.f32.mrf.mxu3 }
  0xab   : >> { %v389_v14 = vadd.f32 %v384_v10, %v351_v11 }
  0xac   : >> { %v413_v23 = vpop.f32.mrf.mxu1 }
  0xad   : >> { %v416_v17 = vadd.f32 %v411_v12, %v389_v14 }
  0xae   : >> { %v447_v16 = vpop.f32.mrf.mxu2 }
  0xaf   : >> { %v452_v21 = vadd.f32 %v447_v16, %v416_v17 }
  0xb1   : >> { %v490_v24 = vadd.f32 %v485_v20, %v452_v21 }
  0xb2   : >> { %v386_v18 = vpop.f32.mrf.mxu0  ;;  %v487_v32 = vpop.f32.mrf.mxu3 }
  0xb3   : >> { %v390_v22 = vadd.f32 %v386_v18, %v352_v19 }
  0xb5   : >> { %v417_v25 = vadd.f32 %v413_v23, %v390_v22 }
  0xb6   : >> { %v449_v27 = vpop.f32.mrf.mxu2 }
  0xb7   : >> { %v453_v30 = vadd.f32 %v449_v27, %v417_v25 }
  0xb9   : >> { %v491_v33 = vadd.f32 %v487_v32, %v453_v30 }
  0xba   : >> { %v512_v28 = vpop.f32.mrf.mxu0 }
  0xbb   : >> { %v517_v29 = vadd.f32 %v512_v28, %v490_v24 }
  0xbd   : >> { %v523_v31 = vadd.f32 %v742_v26, %v517_v29 }
  0xbf   : >> { %527 = vst [vmem:[%s526_s6] sm:$0xff] %v523_v31  ;;  %v537_v37 = vmul.f32 %v523_v31, %v523_v31 }
  0xc2   : >> { %v514_v34 = vpop.f32.mrf.mxu0 }
  0xc3   : >> { %v518_v35 = vadd.f32 %v514_v34, %v491_v33 }
  0xc5   : >> { %v524_v36 = vadd.f32 %v742_v26, %v518_v35 }
  0xc7   : >> { %528 = vst [vmem:[%s526_s6 + $0x8] sm:$0xff] %v524_v36  ;;  %v529_v38 = vadd.f32 %v524_v36, %v523_v31  ;;  %v538_v39 = vmul.f32 %v524_v36, %v524_v36 }
  0xc9   : >> { %v530_v40 = vrot.slane %v529_v38, 4  ;;  %v539_v41 = vadd.f32 %v538_v39, %v537_v37 }
  0xcb   : >> { %v531_v42 = vadd.f32 %v530_v40, %v529_v38  ;;  %v540_v43 = vrot.slane %v539_v41, 4 }
  0xcd   : >> { %v532_v44 = vrot.slane %v531_v42, 2  ;;  %v541_v45 = vadd.f32 %v540_v43, %v539_v41 }
  0xcf   : >> { %v533_v46 = vadd.f32 %v532_v44, %v531_v42  ;;  %v542_v47 = vrot.slane %v541_v45, 2 }
  0xd1   : >> { %v534_v48 = vrot.slane %v533_v46, 1  ;;  %v543_v49 = vadd.f32 %v542_v47, %v541_v45 }
  0xd3   : >> { %v535_v50 = vadd.f32 %v534_v48, %v533_v46  ;;  %v544_v51 = vrot.slane %v543_v49, 1 }
  0xd5   : >> { %v536_v52 = vadd.f32 %v769_v1, %v535_v50   ;;  %v545_v53 = vadd.f32 %v544_v51, %v543_v49  ;;  %214 = sbr.rel (!%p212_p4) target bundleno = 15 (0xf), region = 93 }
  0xd7   : >> { %v546_v54 = vadd.f32 %v765_v0, %v545_v53   ;;  %v916_v1 = vmov %v536_v52  ;;  %547 = vst [vmem:[%s821_s28] sm:$0x1] (%p212_p4), %v536_v52 }
  0xd9   : >> { %v915_v0 = vmov %v546_v54  ;;  %548 = vst [vmem:[%s821_s28 + $0x1] sm:$0x1] (%p212_p4), %v546_v54 }
  0xda PF: > { %s15_s15 = sadd.s32 1, %s761_s15  }
  0xdb   : > { %p12_p5 = scmp.ge.s32.totalorder %s15_s15, 4  }
  0xdd   :  { %14 = sbr.rel (!%p12_p5) target bundleno = 1 (0x1), region = 104 }

// kernel: decoder_block.5
= control target key start
LH: loop header
LB: loop body
LE: loop exit
PB: predicated region body
PF: predicated region fallthrough
CT: control target
= control target key end

     0   :  { %s1049_s0 = inlined_call_operand.vmem [shape: f32[512,128], index: 0, kind: input, shape index: {}]   ;;  %s1050_s1 = inlined_call_operand.vmem [shape: f32[1,128], index: 1, kind: input, shape index: {}]   ;;  %s1051_s2 = inlined_call_operand.vmem [shape: f32[1,128], index: 2, kind: input, shape index: {}]   ;;  %s1052_s3 = inlined_call_operand.vmem [shape: bf16[512,128], index: 3, kind: output, shape index: {}]  }
   0x1   :  { %v14_v0 = vld [vmem:[%s1049_s0] sm:$0xff]  ;;  %v15_v1 = vld [vmem:[%s1049_s0 + $0x8] sm:$0xff]  ;;  %v16_v4 = vld [vmem:[%s1049_s0 + $0x10] sm:$0xff] }
   0x2   :  { %v632_v2 = vld [vmem:[%s1050_s1] ss:$0 sm:$0xff]  ;;  %v17_v5 = vld [vmem:[%s1049_s0 + $0x18] sm:$0xff]  ;;  %v19_v11 = vld [vmem:[%s1049_s0 + $0x28] sm:$0xff] }
   0x3   :  { %v637_v3 = vld [vmem:[%s1051_s2] ss:$0 sm:$0xff]  ;;  %v82_v7 = vmul.f32 %v632_v2, %v14_v0  ;;  %v83_v8 = vmul.f32 %v632_v2, %v15_v1  ;;  %v84_v9 = vmul.f32 %v632_v2, %v16_v4  ;;  %v85_v10 = vmul.f32 %v632_v2, %v17_v5  ;;  %v20_v12 = vld [vmem:[%s1049_s0 + $0x30] sm:$0xff]  ;;  %v21_v13 = vld [vmem:[%s1049_s0 + $0x38] sm:$0xff] }
   0x4   :  { %v18_v6 = vld [vmem:[%s1049_s0 + $0x20] sm:$0xff]  ;;  %v87_v15 = vmul.f32 %v632_v2, %v19_v11  ;;  %v88_v16 = vmul.f32 %v632_v2, %v20_v12  ;;  %v89_v17 = vmul.f32 %v632_v2, %v21_v13  ;;  %v23_v27 = vld [vmem:[%s1049_s0 + $0x48] sm:$0xff]  ;;  %v24_v32 = vld [vmem:[%s1049_s0 + $0x50] sm:$0xff] }
   0x5   :  { %v86_v14 = vmul.f32 %v632_v2, %v18_v6  ;;  %v150_v18 = vadd.f32 %v637_v3, %v82_v7  ;;  %v151_v19 = vadd.f32 %v637_v3, %v83_v8  ;;  %v152_v20 = vadd.f32 %v637_v3, %v84_v9  ;;  %v22_v26 = vld [vmem:[%s1049_s0 + $0x40] sm:$0xff]  ;;  %v25_v33 = vld [vmem:[%s1049_s0 + $0x58] sm:$0xff]  ;;  %v27_v39 = vld [vmem:[%s1049_s0 + $0x68] sm:$0xff] }
   0x6   :  { %v153_v21 = vadd.f32 %v637_v3, %v85_v10  ;;  %v155_v23 = vadd.f32 %v637_v3, %v87_v15  ;;  %v156_v24 = vadd.f32 %v637_v3, %v88_v16  ;;  %v157_v25 = vadd.f32 %v637_v3, %v89_v17  ;;  %v26_v38 = vld [vmem:[%s1049_s0 + $0x60] sm:$0xff]  ;;  %v28_v44 = vld [vmem:[%s1049_s0 + $0x70] sm:$0xff]  ;;  %v29_v45 = vld [vmem:[%s1049_s0 + $0x78] sm:$0xff] }
   0x7   :  { %v154_v22 = vadd.f32 %v637_v3, %v86_v14  ;;  %v214_v28 = vmax.f32 %v150_v18, 0.0  ;;  %v215_v29 = vmax.f32 %v151_v19, 0.0  ;;  %v216_v30 = vmax.f32 %v152_v20, 0.0  ;;  %v30_v58 = vld [vmem:[%s1049_s0 + $0x80] sm:$0xff]  ;;  %v31_v63 = vld [vmem:[%s1049_s0 + $0x88] sm:$0xff]  ;;  %v32_v6 = vld [vmem:[%s1049_s0 + $0x90] sm:$0xff] }
   0x8   :  { %v217_v31 = vmax.f32 %v153_v21, 0.0  ;;  %v219_v35 = vmax.f32 %v155_v23, 0.0  ;;  %v220_v36 = vmax.f32 %v156_v24, 0.0  ;;  %v221_v37 = vmax.f32 %v157_v25, 0.0  ;;  %v33_v7 = vld [vmem:[%s1049_s0 + $0x98] sm:$0xff]  ;;  %v34_v12 = vld [vmem:[%s1049_s0 + $0xa0] sm:$0xff] }
   0x9   :  { %v218_v34 = vmax.f32 %v154_v22, 0.0  ;;  %v413_v40 = vpack.c.bf16 %v215_v29, %v214_v28  ;;  %v90_v42 = vmul.f32 %v632_v2, %v22_v26  ;;  %v91_v43 = vmul.f32 %v632_v2, %v23_v27  ;;  %v35_v13 = vld [vmem:[%s1049_s0 + $0xa8] sm:$0xff]  ;;  %v36_v18 = vld [vmem:[%s1049_s0 + $0xb0] sm:$0xff]  ;;  %v37_v23 = vld [vmem:[%s1049_s0 + $0xb8] sm:$0xff] }
   0xa   :  { %v418_v41 = vpack.c.bf16 %v217_v31, %v216_v30  ;;  %v428_v47 = vpack.c.bf16 %v221_v37, %v220_v36  ;;  %v92_v48 = vmul.f32 %v632_v2, %v24_v32  ;;  %v93_v49 = vmul.f32 %v632_v2, %v25_v33  ;;  %v38_v28 = vld [vmem:[%s1049_s0 + $0xc0] sm:$0xff]  ;;  %v39_v37 = vld [vmem:[%s1049_s0 + $0xc8] sm:$0xff] }
   0xb   :  { %v423_v46 = vpack.c.bf16 %v219_v35, %v218_v34  ;;  %414 = vst [vmem:[%s1052_s3] sm:$0xff] %v413_v40   ;;  %v158_v50 = vadd.f32 %v637_v3, %v90_v42  ;;  %v159_v51 = vadd.f32 %v637_v3, %v91_v43  ;;  %v94_v52 = vmul.f32 %v632_v2, %v26_v38  ;;  %v40_v42 = vld [vmem:[%s1049_s0 + $0xd0] sm:$0xff]  ;;  %v41_v43 = vld [vmem:[%s1049_s0 + $0xd8] sm:$0xff] }
   0xc   :  { %v95_v53 = vmul.f32 %v632_v2, %v27_v39  ;;  %570 = vst [vmem:[%s1052_s3 + $0x8] sm:$0xff] %v418_v41   ;;  %v160_v54 = vadd.f32 %v637_v3, %v92_v48  ;;  %v161_v55 = vadd.f32 %v637_v3, %v93_v49  ;;  %v96_v56 = vmul.f32 %v632_v2, %v28_v44  ;;  %v42_v48 = vld [vmem:[%s1049_s0 + $0xe0] sm:$0xff]  ;;  %v43_v49 = vld [vmem:[%s1049_s0 + $0xe8] sm:$0xff] }
   0xd   :  { %v97_v57 = vmul.f32 %v632_v2, %v29_v45  ;;  %571 = vst [vmem:[%s1052_s3 + $0x10] sm:$0xff] %v423_v46   ;;  %v222_v59 = vmax.f32 %v158_v50, 0.0  ;;  %v223_v60 = vmax.f32 %v159_v51, 0.0  ;;  %v162_v61 = vadd.f32 %v637_v3, %v94_v52 }
   0xe   :  { %v163_v62 = vadd.f32 %v637_v3, %v95_v53  ;;  %572 = vst [vmem:[%s1052_s3 + $0x18] sm:$0xff] %v428_v47   ;;  %v224_v0 = vmax.f32 %v160_v54, 0.0  ;;  %v225_v1 = vmax.f32 %v161_v55, 0.0  ;;  %v164_v4 = vadd.f32 %v637_v3, %v96_v56  ;;  %v44_v54 = vld [vmem:[%s1049_s0 + $0xf0] sm:$0xff] }
   0xf   :  { %v165_v5 = vadd.f32 %v637_v3, %v97_v57  ;;  %v433_v8 = vpack.c.bf16 %v223_v60, %v222_v59  ;;  %v226_v9 = vmax.f32 %v162_v61, 0.0  ;;  %v98_v11 = vmul.f32 %v632_v2, %v30_v58  ;;  %v45_v59 = vld [vmem:[%s1049_s0 + $0xf8] sm:$0xff] }
  0x10   :  { %v227_v10 = vmax.f32 %v163_v62, 0.0  ;;  %v438_v14 = vpack.c.bf16 %v225_v1, %v224_v0  ;;  %v228_v15 = vmax.f32 %v164_v4, 0.0  ;;  %v99_v17 = vmul.f32 %v632_v2, %v31_v63  ;;  %v46_v0 = vld [vmem:[%s1049_s0 + $0x100] sm:$0xff] }
  0x11   :  { %v229_v16 = vmax.f32 %v165_v5, 0.0  ;;  %573 = vst [vmem:[%s1052_s3 + $0x20] sm:$0xff] %v433_v8   ;;  %v166_v20 = vadd.f32 %v637_v3, %v98_v11  ;;  %v100_v21 = vmul.f32 %v632_v2, %v32_v6  ;;  %v101_v22 = vmul.f32 %v632_v2, %v33_v7  ;;  %v47_v11 = vld [vmem:[%s1049_s0 + $0x108] sm:$0xff] }
  0x12   :  { %v443_v19 = vpack.c.bf16 %v227_v10, %v226_v9  ;;  %574 = vst [vmem:[%s1052_s3 + $0x28] sm:$0xff] %v438_v14   ;;  %v167_v25 = vadd.f32 %v637_v3, %v99_v17  ;;  %v102_v26 = vmul.f32 %v632_v2, %v34_v12  ;;  %v103_v27 = vmul.f32 %v632_v2, %v35_v13  ;;  %v49_v17 = vld [vmem:[%s1049_s0 + $0x118] sm:$0xff] }
  0x13   :  { %v448_v24 = vpack.c.bf16 %v229_v16, %v228_v15  ;;  %v230_v29 = vmax.f32 %v166_v20, 0.0  ;;  %v168_v30 = vadd.f32 %v637_v3, %v100_v21  ;;  %v169_v31 = vadd.f32 %v637_v3, %v101_v22  ;;  %v48_v16 = vld [vmem:[%s1049_s0 + $0x110] sm:$0xff]  ;;  %v50_v22 = vld [vmem:[%s1049_s0 + $0x120] sm:$0xff] }
  0x14   :  { %575 = vst [vmem:[%s1052_s3 + $0x30] sm:$0xff] %v443_v19   ;;  %v104_v32 = vmul.f32 %v632_v2, %v36_v18  ;;  %v231_v33 = vmax.f32 %v167_v25, 0.0  ;;  %v170_v34 = vadd.f32 %v637_v3, %v102_v26  ;;  %v171_v35 = vadd.f32 %v637_v3, %v103_v27 }
  0x15   :  { %576 = vst [vmem:[%s1052_s3 + $0x38] sm:$0xff] %v448_v24   ;;  %v105_v36 = vmul.f32 %v632_v2, %v37_v23  ;;  %v232_v38 = vmax.f32 %v168_v30, 0.0  ;;  %v233_v39 = vmax.f32 %v169_v31, 0.0  ;;  %v106_v41 = vmul.f32 %v632_v2, %v38_v28  ;;  %v51_v23 = vld [vmem:[%s1049_s0 + $0x128] sm:$0xff]  ;;  %v52_v28 = vld [vmem:[%s1049_s0 + $0x130] sm:$0xff] }
  0x16   :  { %v172_v40 = vadd.f32 %v637_v3, %v104_v32  ;;  %v453_v44 = vpack.c.bf16 %v231_v33, %v230_v29  ;;  %v234_v45 = vmax.f32 %v170_v34, 0.0  ;;  %v235_v46 = vmax.f32 %v171_v35, 0.0  ;;  %v53_v33 = vld [vmem:[%s1049_s0 + $0x138] sm:$0xff] }
  0x17   :  { %v173_v47 = vadd.f32 %v637_v3, %v105_v36  ;;  %v458_v50 = vpack.c.bf16 %v233_v39, %v232_v38  ;;  %v107_v52 = vmul.f32 %v632_v2, %v39_v37  ;;  %v174_v53 = vadd.f32 %v637_v3, %v106_v41  ;;  %v54_v38 = vld [vmem:[%s1049_s0 + $0x140] sm:$0xff] }
  0x18   :  { %v236_v51 = vmax.f32 %v172_v40, 0.0  ;;  %577 = vst [vmem:[%s1052_s3 + $0x40] sm:$0xff] %v453_v44   ;;  %v463_v55 = vpack.c.bf16 %v235_v46, %v234_v45  ;;  %v108_v57 = vmul.f32 %v632_v2, %v40_v42  ;;  %v109_v58 = vmul.f32 %v632_v2, %v41_v43 }
  0x19   :  { %v237_v56 = vmax.f32 %v173_v47, 0.0  ;;  %578 = vst [vmem:[%s1052_s3 + $0x48] sm:$0xff] %v458_v50   ;;  %v175_v60 = vadd.f32 %v637_v3, %v107_v52  ;;  %v238_v61 = vmax.f32 %v174_v53, 0.0  ;;  %v110_v62 = vmul.f32 %v632_v2, %v42_v48  ;;  %v55_v47 = vld [vmem:[%s1049_s0 + $0x148] sm:$0xff]  ;;  %v56_v52 = vld [vmem:[%s1049_s0 + $0x150] sm:$0xff]  ;;  %v57_v53 = vld [vmem:[%s1049_s0 + $0x158] sm:$0xff] }
  0x1a   :  { %v111_v63 = vmul.f32 %v632_v2, %v43_v49  ;;  %579 = vst [vmem:[%s1052_s3 + $0x50] sm:$0xff] %v463_v55   ;;  %v176_v4 = vadd.f32 %v637_v3, %v108_v57  ;;  %v177_v5 = vadd.f32 %v637_v3, %v109_v58  ;;  %v112_v6 = vmul.f32 %v632_v2, %v44_v54  ;;  %v58_v58 = vld [vmem:[%s1049_s0 + $0x160] sm:$0xff] }
  0x1b   :  { %v468_v1 = vpack.c.bf16 %v237_v56, %v236_v51  ;;  %v239_v7 = vmax.f32 %v175_v60, 0.0  ;;  %v178_v8 = vadd.f32 %v637_v3, %v110_v62  ;;  %v113_v10 = vmul.f32 %v632_v2, %v45_v59  ;;  %v59_v59 = vld [vmem:[%s1049_s0 + $0x168] sm:$0xff] }
  0x1c   :  { %v179_v9 = vadd.f32 %v637_v3, %v111_v63  ;;  %v240_v12 = vmax.f32 %v176_v4, 0.0  ;;  %v241_v13 = vmax.f32 %v177_v5, 0.0  ;;  %v180_v14 = vadd.f32 %v637_v3, %v112_v6 }
  0x1d   :  { %580 = vst [vmem:[%s1052_s3 + $0x58] sm:$0xff] %v468_v1   ;;  %v114_v15 = vmul.f32 %v632_v2, %v46_v0  ;;  %v473_v18 = vpack.c.bf16 %v239_v7, %v238_v61  ;;  %v242_v19 = vmax.f32 %v178_v8, 0.0  ;;  %v181_v21 = vadd.f32 %v637_v3, %v113_v10  ;;  %v60_v0 = vld [vmem:[%s1049_s0 + $0x170] sm:$0xff]  ;;  %v61_v7 = vld [vmem:[%s1049_s0 + $0x178] sm:$0xff] }
  0x1e   :  { %v243_v20 = vmax.f32 %v179_v9, 0.0  ;;  %v478_v24 = vpack.c.bf16 %v241_v13, %v240_v12  ;;  %v244_v25 = vmax.f32 %v180_v14, 0.0  ;;  %v115_v26 = vmul.f32 %v632_v2, %v47_v11  ;;  %v62_v12 = vld [vmem:[%s1049_s0 + $0x180] sm:$0xff] }
  0x1f   :  { %v182_v27 = vadd.f32 %v637_v3, %v114_v15  ;;  %581 = vst [vmem:[%s1052_s3 + $0x60] sm:$0xff] %v473_v18   ;;  %v245_v30 = vmax.f32 %v181_v21, 0.0  ;;  %v116_v31 = vmul.f32 %v632_v2, %v48_v16  ;;  %v117_v32 = vmul.f32 %v632_v2, %v49_v17  ;;  %v63_v21 = vld [vmem:[%s1049_s0 + $0x188] sm:$0xff] }
  0x20   :  { %v483_v29 = vpack.c.bf16 %v243_v20, %v242_v19  ;;  %582 = vst [vmem:[%s1052_s3 + $0x68] sm:$0xff] %v478_v24   ;;  %v183_v34 = vadd.f32 %v637_v3, %v115_v26  ;;  %v118_v36 = vmul.f32 %v632_v2, %v50_v22  ;;  %v119_v37 = vmul.f32 %v632_v2, %v51_v23  ;;  %v64_v26 = vld [vmem:[%s1049_s0 + $0x190] sm:$0xff] }
  0x21   :  { %v246_v35 = vmax.f32 %v182_v27, 0.0  ;;  %v488_v39 = vpack.c.bf16 %v245_v30, %v244_v25  ;;  %v184_v40 = vadd.f32 %v637_v3, %v116_v31  ;;  %v185_v41 = vadd.f32 %v637_v3, %v117_v32  ;;  %v65_v27 = vld [vmem:[%s1049_s0 + $0x198] sm:$0xff]  ;;  %v66_v32 = vld [vmem:[%s1049_s0 + $0x1a0] sm:$0xff] }
  0x22   :  { %583 = vst [vmem:[%s1052_s3 + $0x70] sm:$0xff] %v483_v29   ;;  %v120_v42 = vmul.f32 %v632_v2, %v52_v28  ;;  %v247_v43 = vmax.f32 %v183_v34, 0.0  ;;  %v186_v44 = vadd.f32 %v637_v3, %v118_v36  ;;  %v187_v45 = vadd.f32 %v637_v3, %v119_v37 }
  0x23   :  { %v121_v46 = vmul.f32 %v632_v2, %v53_v33  ;;  %584 = vst [vmem:[%s1052_s3 + $0x78] sm:$0xff] %v488_v39   ;;  %v248_v48 = vmax.f32 %v184_v40, 0.0  ;;  %v249_v49 = vmax.f32 %v185_v41, 0.0  ;;  %v122_v51 = vmul.f32 %v632_v2, %v54_v38  ;;  %v67_v33 = vld [vmem:[%s1049_s0 + $0x1a8] sm:$0xff]  ;;  %v68_v38 = vld [vmem:[%s1049_s0 + $0x1b0] sm:$0xff] }
  0x24   :  { %v188_v50 = vadd.f32 %v637_v3, %v120_v42  ;;  %v493_v54 = vpack.c.bf16 %v247_v43, %v246_v35  ;;  %v250_v55 = vmax.f32 %v186_v44, 0.0  ;;  %v251_v56 = vmax.f32 %v187_v45, 0.0  ;;  %v69_v43 = vld [vmem:[%s1049_s0 + $0x1b8] sm:$0xff] }
  0x25   :  { %v189_v57 = vadd.f32 %v637_v3, %v121_v46  ;;  %v498_v60 = vpack.c.bf16 %v249_v49, %v248_v48  ;;  %v123_v62 = vmul.f32 %v632_v2, %v55_v47  ;;  %v190_v63 = vadd.f32 %v637_v3, %v122_v51  ;;  %v70_v48 = vld [vmem:[%s1049_s0 + $0x1c0] sm:$0xff] }
  0x26   :  { %v252_v61 = vmax.f32 %v188_v50, 0.0  ;;  %585 = vst [vmem:[%s1052_s3 + $0x80] sm:$0xff] %v493_v54   ;;  %v503_v1 = vpack.c.bf16 %v251_v56, %v250_v55  ;;  %v124_v5 = vmul.f32 %v632_v2, %v56_v52  ;;  %v125_v6 = vmul.f32 %v632_v2, %v57_v53 }
  0x27   :  { %v253_v4 = vmax.f32 %v189_v57, 0.0  ;;  %586 = vst [vmem:[%s1052_s3 + $0x88] sm:$0xff] %v498_v60   ;;  %v191_v8 = vadd.f32 %v637_v3, %v123_v62  ;;  %v254_v9 = vmax.f32 %v190_v63, 0.0  ;;  %v126_v10 = vmul.f32 %v632_v2, %v58_v58  ;;  %v71_v57 = vld [vmem:[%s1049_s0 + $0x1c8] sm:$0xff]  ;;  %v72_v62 = vld [vmem:[%s1049_s0 + $0x1d0] sm:$0xff]  ;;  %v73_v63 = vld [vmem:[%s1049_s0 + $0x1d8] sm:$0xff] }
  0x28   :  { %v127_v11 = vmul.f32 %v632_v2, %v59_v59  ;;  %587 = vst [vmem:[%s1052_s3 + $0x90] sm:$0xff] %v503_v1   ;;  %v192_v14 = vadd.f32 %v637_v3, %v124_v5  ;;  %v193_v15 = vadd.f32 %v637_v3, %v125_v6  ;;  %v128_v16 = vmul.f32 %v632_v2, %v60_v0  ;;  %v74_v6 = vld [vmem:[%s1049_s0 + $0x1e0] sm:$0xff] }
  0x29   :  { %v508_v13 = vpack.c.bf16 %v253_v4, %v252_v61  ;;  %v255_v17 = vmax.f32 %v191_v8, 0.0  ;;  %v194_v18 = vadd.f32 %v637_v3, %v126_v10  ;;  %v129_v20 = vmul.f32 %v632_v2, %v61_v7  ;;  %v75_v7 = vld [vmem:[%s1049_s0 + $0x1e8] sm:$0xff] }
  0x2a   :  { %v195_v19 = vadd.f32 %v637_v3, %v127_v11  ;;  %v256_v22 = vmax.f32 %v192_v14, 0.0  ;;  %v257_v23 = vmax.f32 %v193_v15, 0.0  ;;  %v196_v24 = vadd.f32 %v637_v3, %v128_v16 }
  0x2b   :  { %588 = vst [vmem:[%s1052_s3 + $0x98] sm:$0xff] %v508_v13   ;;  %v130_v25 = vmul.f32 %v632_v2, %v62_v12  ;;  %v513_v28 = vpack.c.bf16 %v255_v17, %v254_v9  ;;  %v258_v29 = vmax.f32 %v194_v18, 0.0  ;;  %v197_v31 = vadd.f32 %v637_v3, %v129_v20  ;;  %v76_v12 = vld [vmem:[%s1049_s0 + $0x1f0] sm:$0xff]  ;;  %v77_v17 = vld [vmem:[%s1049_s0 + $0x1f8] sm:$0xff] }
  0x2c   :  { %v259_v30 = vmax.f32 %v195_v19, 0.0  ;;  %v518_v34 = vpack.c.bf16 %v257_v23, %v256_v22  ;;  %v260_v35 = vmax.f32 %v196_v24, 0.0  ;;  %v131_v36 = vmul.f32 %v632_v2, %v63_v21 }
  0x2d   :  { %v198_v37 = vadd.f32 %v637_v3, %v130_v25  ;;  %589 = vst [vmem:[%s1052_s3 + $0xa0] sm:$0xff] %v513_v28   ;;  %v261_v40 = vmax.f32 %v197_v31, 0.0  ;;  %v132_v41 = vmul.f32 %v632_v2, %v64_v26  ;;  %v133_v42 = vmul.f32 %v632_v2, %v65_v27 }
  0x2e   :  { %v523_v39 = vpack.c.bf16 %v259_v30, %v258_v29  ;;  %590 = vst [vmem:[%s1052_s3 + $0xa8] sm:$0xff] %v518_v34   ;;  %v199_v44 = vadd.f32 %v637_v3, %v131_v36  ;;  %v134_v46 = vmul.f32 %v632_v2, %v66_v32  ;;  %v135_v47 = vmul.f32 %v632_v2, %v67_v33 }
  0x2f   :  { %v262_v45 = vmax.f32 %v198_v37, 0.0  ;;  %v528_v49 = vpack.c.bf16 %v261_v40, %v260_v35  ;;  %v200_v50 = vadd.f32 %v637_v3, %v132_v41  ;;  %v201_v51 = vadd.f32 %v637_v3, %v133_v42 }
  0x30   :  { %591 = vst [vmem:[%s1052_s3 + $0xb0] sm:$0xff] %v523_v39   ;;  %v136_v52 = vmul.f32 %v632_v2, %v68_v38  ;;  %v263_v53 = vmax.f32 %v199_v44, 0.0  ;;  %v202_v54 = vadd.f32 %v637_v3, %v134_v46  ;;  %v203_v55 = vadd.f32 %v637_v3, %v135_v47 }
  0x31   :  { %v137_v56 = vmul.f32 %v632_v2, %v69_v43  ;;  %592 = vst [vmem:[%s1052_s3 + $0xb8] sm:$0xff] %v528_v49   ;;  %v264_v58 = vmax.f32 %v200_v50, 0.0  ;;  %v265_v59 = vmax.f32 %v201_v51, 0.0  ;;  %v138_v61 = vmul.f32 %v632_v2, %v70_v48 }
  0x32   :  { %v204_v60 = vadd.f32 %v637_v3, %v136_v52  ;;  %v533_v0 = vpack.c.bf16 %v263_v53, %v262_v45  ;;  %v266_v1 = vmax.f32 %v202_v54, 0.0  ;;  %v267_v4 = vmax.f32 %v203_v55, 0.0 }
  0x33   :  { %v205_v5 = vadd.f32 %v637_v3, %v137_v56  ;;  %v538_v8 = vpack.c.bf16 %v265_v59, %v264_v58  ;;  %v139_v10 = vmul.f32 %v632_v2, %v71_v57  ;;  %v206_v11 = vadd.f32 %v637_v3, %v138_v61 }
  0x34   :  { %v268_v9 = vmax.f32 %v204_v60, 0.0  ;;  %593 = vst [vmem:[%s1052_s3 + $0xc0] sm:$0xff] %v533_v0   ;;  %v543_v13 = vpack.c.bf16 %v267_v4, %v266_v1  ;;  %v140_v15 = vmul.f32 %v632_v2, %v72_v62  ;;  %v141_v16 = vmul.f32 %v632_v2, %v73_v63 }
  0x35   :  { %v269_v14 = vmax.f32 %v205_v5, 0.0  ;;  %594 = vst [vmem:[%s1052_s3 + $0xc8] sm:$0xff] %v538_v8   ;;  %v207_v18 = vadd.f32 %v637_v3, %v139_v10  ;;  %v270_v19 = vmax.f32 %v206_v11, 0.0  ;;  %v142_v20 = vmul.f32 %v632_v2, %v74_v6 }
  0x36   :  { %v143_v21 = vmul.f32 %v632_v2, %v75_v7  ;;  %595 = vst [vmem:[%s1052_s3 + $0xd0] sm:$0xff] %v543_v13   ;;  %v208_v23 = vadd.f32 %v637_v3, %v140_v15  ;;  %v209_v24 = vadd.f32 %v637_v3, %v141_v16  ;;  %v144_v25 = vmul.f32 %v632_v2, %v76_v12 }
  0x37   :  { %v548_v22 = vpack.c.bf16 %v269_v14, %v268_v9  ;;  %v271_v26 = vmax.f32 %v207_v18, 0.0  ;;  %v210_v27 = vadd.f32 %v637_v3, %v142_v20  ;;  %v145_v29 = vmul.f32 %v632_v2, %v77_v17 }
  0x38   :  { %v211_v28 = vadd.f32 %v637_v3, %v143_v21  ;;  %v272_v30 = vmax.f32 %v208_v23, 0.0  ;;  %v273_v31 = vmax.f32 %v209_v24, 0.0  ;;  %v212_v32 = vadd.f32 %v637_v3, %v144_v25 }
  0x39   :  { %596 = vst [vmem:[%s1052_s3 + $0xd8] sm:$0xff] %v548_v22   ;;  %v553_v33 = vpack.c.bf16 %v271_v26, %v270_v19  ;;  %v274_v34 = vmax.f32 %v210_v27, 0.0  ;;  %v213_v36 = vadd.f32 %v637_v3, %v145_v29 }
  0x3a   :  { %v275_v35 = vmax.f32 %v211_v28, 0.0  ;;  %v558_v37 = vpack.c.bf16 %v273_v31, %v272_v30  ;;  %v276_v38 = vmax.f32 %v212_v32, 0.0 }
  0x3b   :  { %597 = vst [vmem:[%s1052_s3 + $0xe0] sm:$0xff] %v553_v33   ;;  %v277_v39 = vmax.f32 %v213_v36, 0.0 }
  0x3c   :  { %v563_v2 = vpack.c.bf16 %v275_v35, %v274_v34  ;;  %598 = vst [vmem:[%s1052_s3 + $0xe8] sm:$0xff] %v558_v37  }
  0x3d   :  { %v568_v40 = vpack.c.bf16 %v277_v39, %v276_v38 }
  0x3e   :  { %599 = vst [vmem:[%s1052_s3 + $0xf0] sm:$0xff] %v563_v2  }
  0x3f   :  { %600 = vst [vmem:[%s1052_s3 + $0xf8] sm:$0xff] %v568_v40  }

// kernel: decoder_block.7
= control target key start
LH: loop header
LB: loop body
LE: loop exit
PB: predicated region body
PF: predicated region fallthrough
CT: control target
= control target key end

     0   :  { %s893_s0 = inlined_call_operand.vmem [shape: f32[512,128], index: 0, kind: input, shape index: {}]   ;;  %s894_s1 = inlined_call_operand.vmem [shape: f32[1,128], index: 1, kind: input, shape index: {}]   ;;  %s895_s2 = inlined_call_operand.vmem [shape: f32[1,128], index: 2, kind: input, shape index: {}]   ;;  %s896_s3 = inlined_call_operand.vmem [shape: f32[512,128], index: 3, kind: output, shape index: {}]  }
   0x1   :  { %v14_v0 = vld [vmem:[%s893_s0] sm:$0xff]  ;;  %v15_v3 = vld [vmem:[%s893_s0 + $0x8] sm:$0xff]  ;;  %v16_v6 = vld [vmem:[%s893_s0 + $0x10] sm:$0xff] }
   0x2   :  { %v374_v1 = vld [vmem:[%s894_s1] ss:$0 sm:$0xff]  ;;  %v17_v7 = vld [vmem:[%s893_s0 + $0x18] sm:$0xff]  ;;  %v19_v12 = vld [vmem:[%s893_s0 + $0x28] sm:$0xff] }
   0x3   :  { %v379_v2 = vld [vmem:[%s895_s2] ss:$0 sm:$0xff]  ;;  %v82_v4 = vmul.f32 %v374_v1, %v14_v0  ;;  %v83_v5 = vmul.f32 %v374_v1, %v15_v3  ;;  %v84_v9 = vmul.f32 %v374_v1, %v16_v6  ;;  %v85_v10 = vmul.f32 %v374_v1, %v17_v7  ;;  %v20_v13 = vld [vmem:[%s893_s0 + $0x30] sm:$0xff]  ;;  %v21_v14 = vld [vmem:[%s893_s0 + $0x38] sm:$0xff] }
   0x4   :  { %v18_v8 = vld [vmem:[%s893_s0 + $0x20] sm:$0xff]  ;;  %v87_v17 = vmul.f32 %v374_v1, %v19_v12  ;;  %v88_v18 = vmul.f32 %v374_v1, %v20_v13  ;;  %v89_v22 = vmul.f32 %v374_v1, %v21_v14  ;;  %v23_v24 = vld [vmem:[%s893_s0 + $0x48] sm:$0xff]  ;;  %v24_v29 = vld [vmem:[%s893_s0 + $0x50] sm:$0xff] }
   0x5   :  { %v86_v11 = vmul.f32 %v374_v1, %v18_v8  ;;  %v150_v15 = vadd.f32 %v379_v2, %v82_v4  ;;  %v151_v16 = vadd.f32 %v379_v2, %v83_v5  ;;  %v152_v19 = vadd.f32 %v379_v2, %v84_v9  ;;  %v22_v23 = vld [vmem:[%s893_s0 + $0x40] sm:$0xff]  ;;  %v25_v30 = vld [vmem:[%s893_s0 + $0x58] sm:$0xff]  ;;  %v27_v35 = vld [vmem:[%s893_s0 + $0x68] sm:$0xff] }
   0x6   :  { %v153_v20 = vadd.f32 %v379_v2, %v85_v10  ;;  %v155_v27 = vadd.f32 %v379_v2, %v87_v17  ;;  %v156_v28 = vadd.f32 %v379_v2, %v88_v18  ;;  %v26_v31 = vld [vmem:[%s893_s0 + $0x60] sm:$0xff]  ;;  %v157_v34 = vadd.f32 %v379_v2, %v89_v22  ;;  %v28_v36 = vld [vmem:[%s893_s0 + $0x70] sm:$0xff]  ;;  %v29_v41 = vld [vmem:[%s893_s0 + $0x78] sm:$0xff] }
   0x7   :  { %v154_v21 = vadd.f32 %v379_v2, %v86_v11  ;;  %v214_v25 = vmax.f32 %v150_v15, 0.0  ;;  %v215_v26 = vmax.f32 %v151_v16, 0.0  ;;  %v216_v32 = vmax.f32 %v152_v19, 0.0  ;;  %v30_v54 = vld [vmem:[%s893_s0 + $0x80] sm:$0xff]  ;;  %v31_v55 = vld [vmem:[%s893_s0 + $0x88] sm:$0xff]  ;;  %v32_v58 = vld [vmem:[%s893_s0 + $0x90] sm:$0xff] }
   0x8   :  { %v217_v33 = vmax.f32 %v153_v20, 0.0  ;;  %v219_v38 = vmax.f32 %v155_v27, 0.0  ;;  %v90_v39 = vmul.f32 %v374_v1, %v22_v23  ;;  %v91_v40 = vmul.f32 %v374_v1, %v23_v24  ;;  %v33_v59 = vld [vmem:[%s893_s0 + $0x98] sm:$0xff]  ;;  %v34_v62 = vld [vmem:[%s893_s0 + $0xa0] sm:$0xff]  ;;  %v35_v5 = vld [vmem:[%s893_s0 + $0xa8] sm:$0xff] }
   0x9   :  { %278 = vst [vmem:[%s896_s3] sm:$0xff] %v214_v25  ;;  %v218_v37 = vmax.f32 %v154_v21, 0.0  ;;  %v220_v42 = vmax.f32 %v156_v28, 0.0  ;;  %v92_v43 = vmul.f32 %v374_v1, %v24_v29  ;;  %v93_v44 = vmul.f32 %v374_v1, %v25_v30  ;;  %v36_v10 = vld [vmem:[%s893_s0 + $0xb0] sm:$0xff]  ;;  %v37_v14 = vld [vmem:[%s893_s0 + $0xb8] sm:$0xff]  ;;  %v38_v18 = vld [vmem:[%s893_s0 + $0xc0] sm:$0xff] }
   0xa   :  { %279 = vst [vmem:[%s896_s3 + $0x8] sm:$0xff] %v215_v26  ;;  %v94_v45 = vmul.f32 %v374_v1, %v26_v31  ;;  %v158_v46 = vadd.f32 %v379_v2, %v90_v39  ;;  %v159_v47 = vadd.f32 %v379_v2, %v91_v40  ;;  %v95_v48 = vmul.f32 %v374_v1, %v27_v35  ;;  %v39_v22 = vld [vmem:[%s893_s0 + $0xc8] sm:$0xff]  ;;  %v40_v26 = vld [vmem:[%s893_s0 + $0xd0] sm:$0xff]  ;;  %v41_v30 = vld [vmem:[%s893_s0 + $0xd8] sm:$0xff] }
   0xb   :  { %280 = vst [vmem:[%s896_s3 + $0x10] sm:$0xff] %v216_v32  ;;  %v96_v49 = vmul.f32 %v374_v1, %v28_v36  ;;  %v221_v50 = vmax.f32 %v157_v34, 0.0  ;;  %v160_v51 = vadd.f32 %v379_v2, %v92_v43  ;;  %v161_v52 = vadd.f32 %v379_v2, %v93_v44  ;;  %v42_v34 = vld [vmem:[%s893_s0 + $0xe0] sm:$0xff] }
   0xc   :  { %281 = vst [vmem:[%s896_s3 + $0x18] sm:$0xff] %v217_v33  ;;  %v97_v53 = vmul.f32 %v374_v1, %v29_v41  ;;  %v222_v56 = vmax.f32 %v158_v46, 0.0  ;;  %v162_v57 = vadd.f32 %v379_v2, %v94_v45  ;;  %v223_v60 = vmax.f32 %v159_v47, 0.0  ;;  %v45_v46 = vld [vmem:[%s893_s0 + $0xf8] sm:$0xff] }
   0xd   :  { %282 = vst [vmem:[%s896_s3 + $0x20] sm:$0xff] %v218_v37  ;;  %v163_v61 = vadd.f32 %v379_v2, %v95_v48  ;;  %v224_v63 = vmax.f32 %v160_v51, 0.0  ;;  %v164_v0 = vadd.f32 %v379_v2, %v96_v49  ;;  %v98_v3 = vmul.f32 %v374_v1, %v30_v54  ;;  %v47_v54 = vld [vmem:[%s893_s0 + $0x108] sm:$0xff] }
   0xe   :  { %283 = vst [vmem:[%s896_s3 + $0x28] sm:$0xff] %v219_v38  ;;  %v99_v4 = vmul.f32 %v374_v1, %v31_v55  ;;  %v225_v6 = vmax.f32 %v161_v52, 0.0  ;;  %v165_v7 = vadd.f32 %v379_v2, %v97_v53  ;;  %v100_v8 = vmul.f32 %v374_v1, %v32_v58  ;;  %v43_v38 = vld [vmem:[%s893_s0 + $0xe8] sm:$0xff]  ;;  %v48_v58 = vld [vmem:[%s893_s0 + $0x110] sm:$0xff] }
   0xf   :  { %284 = vst [vmem:[%s896_s3 + $0x30] sm:$0xff] %v220_v42  ;;  %v101_v9 = vmul.f32 %v374_v1, %v33_v59  ;;  %v226_v11 = vmax.f32 %v162_v57, 0.0  ;;  %v166_v12 = vadd.f32 %v379_v2, %v98_v3  ;;  %v102_v13 = vmul.f32 %v374_v1, %v34_v62  ;;  %v44_v42 = vld [vmem:[%s893_s0 + $0xf0] sm:$0xff]  ;;  %v49_v62 = vld [vmem:[%s893_s0 + $0x118] sm:$0xff] }
  0x10   :  { %285 = vst [vmem:[%s896_s3 + $0x38] sm:$0xff] %v221_v50  ;;  %v227_v15 = vmax.f32 %v163_v61, 0.0  ;;  %v167_v16 = vadd.f32 %v379_v2, %v99_v4  ;;  %v103_v17 = vmul.f32 %v374_v1, %v35_v5  ;;  %v228_v19 = vmax.f32 %v164_v0, 0.0  ;;  %v46_v50 = vld [vmem:[%s893_s0 + $0x100] sm:$0xff] }
  0x11   :  { %286 = vst [vmem:[%s896_s3 + $0x40] sm:$0xff] %v222_v56  ;;  %v168_v20 = vadd.f32 %v379_v2, %v100_v8  ;;  %v104_v21 = vmul.f32 %v374_v1, %v36_v10  ;;  %v229_v23 = vmax.f32 %v165_v7, 0.0  ;;  %v169_v24 = vadd.f32 %v379_v2, %v101_v9  ;;  %v50_v4 = vld [vmem:[%s893_s0 + $0x120] sm:$0xff]  ;;  %v51_v8 = vld [vmem:[%s893_s0 + $0x128] sm:$0xff] }
  0x12   :  { %287 = vst [vmem:[%s896_s3 + $0x48] sm:$0xff] %v223_v60  ;;  %v105_v25 = vmul.f32 %v374_v1, %v37_v14  ;;  %v230_v27 = vmax.f32 %v166_v12, 0.0  ;;  %v170_v28 = vadd.f32 %v379_v2, %v102_v13  ;;  %v106_v29 = vmul.f32 %v374_v1, %v38_v18  ;;  %v52_v12 = vld [vmem:[%s893_s0 + $0x130] sm:$0xff] }
  0x13   :  { %288 = vst [vmem:[%s896_s3 + $0x50] sm:$0xff] %v224_v63  ;;  %v231_v31 = vmax.f32 %v167_v16, 0.0  ;;  %v171_v32 = vadd.f32 %v379_v2, %v103_v17  ;;  %v107_v33 = vmul.f32 %v374_v1, %v39_v22  ;;  %v232_v35 = vmax.f32 %v168_v20, 0.0  ;;  %v53_v16 = vld [vmem:[%s893_s0 + $0x138] sm:$0xff]  ;;  %v54_v20 = vld [vmem:[%s893_s0 + $0x140] sm:$0xff] }
  0x14   :  { %289 = vst [vmem:[%s896_s3 + $0x58] sm:$0xff] %v225_v6  ;;  %v172_v36 = vadd.f32 %v379_v2, %v104_v21  ;;  %v108_v37 = vmul.f32 %v374_v1, %v40_v26  ;;  %v233_v39 = vmax.f32 %v169_v24, 0.0  ;;  %v173_v40 = vadd.f32 %v379_v2, %v105_v25  ;;  %v55_v24 = vld [vmem:[%s893_s0 + $0x148] sm:$0xff] }
  0x15   :  { %290 = vst [vmem:[%s896_s3 + $0x60] sm:$0xff] %v226_v11  ;;  %v109_v41 = vmul.f32 %v374_v1, %v41_v30  ;;  %v234_v43 = vmax.f32 %v170_v28, 0.0  ;;  %v174_v44 = vadd.f32 %v379_v2, %v106_v29  ;;  %v110_v45 = vmul.f32 %v374_v1, %v42_v34  ;;  %v56_v28 = vld [vmem:[%s893_s0 + $0x150] sm:$0xff] }
  0x16   :  { %291 = vst [vmem:[%s896_s3 + $0x68] sm:$0xff] %v227_v15  ;;  %v235_v47 = vmax.f32 %v171_v32, 0.0  ;;  %v175_v48 = vadd.f32 %v379_v2, %v107_v33  ;;  %v111_v49 = vmul.f32 %v374_v1, %v43_v38  ;;  %v236_v51 = vmax.f32 %v172_v36, 0.0  ;;  %v57_v32 = vld [vmem:[%s893_s0 + $0x158] sm:$0xff]  ;;  %v58_v36 = vld [vmem:[%s893_s0 + $0x160] sm:$0xff] }
  0x17   :  { %292 = vst [vmem:[%s896_s3 + $0x70] sm:$0xff] %v228_v19  ;;  %v176_v52 = vadd.f32 %v379_v2, %v108_v37  ;;  %v112_v53 = vmul.f32 %v374_v1, %v44_v42  ;;  %v237_v55 = vmax.f32 %v173_v40, 0.0  ;;  %v177_v56 = vadd.f32 %v379_v2, %v109_v41  ;;  %v59_v40 = vld [vmem:[%s893_s0 + $0x168] sm:$0xff] }
  0x18   :  { %293 = vst [vmem:[%s896_s3 + $0x78] sm:$0xff] %v229_v23  ;;  %v113_v57 = vmul.f32 %v374_v1, %v45_v46  ;;  %v238_v59 = vmax.f32 %v174_v44, 0.0  ;;  %v178_v60 = vadd.f32 %v379_v2, %v110_v45  ;;  %v114_v61 = vmul.f32 %v374_v1, %v46_v50  ;;  %v60_v44 = vld [vmem:[%s893_s0 + $0x170] sm:$0xff] }
  0x19   :  { %294 = vst [vmem:[%s896_s3 + $0x80] sm:$0xff] %v230_v27  ;;  %v239_v63 = vmax.f32 %v175_v48, 0.0  ;;  %v179_v0 = vadd.f32 %v379_v2, %v111_v49  ;;  %v115_v3 = vmul.f32 %v374_v1, %v47_v54  ;;  %v240_v5 = vmax.f32 %v176_v52, 0.0  ;;  %v61_v48 = vld [vmem:[%s893_s0 + $0x178] sm:$0xff]  ;;  %v62_v52 = vld [vmem:[%s893_s0 + $0x180] sm:$0xff] }
  0x1a   :  { %295 = vst [vmem:[%s896_s3 + $0x88] sm:$0xff] %v231_v31  ;;  %v180_v6 = vadd.f32 %v379_v2, %v112_v53  ;;  %v116_v7 = vmul.f32 %v374_v1, %v48_v58  ;;  %v241_v9 = vmax.f32 %v177_v56, 0.0  ;;  %v181_v10 = vadd.f32 %v379_v2, %v113_v57  ;;  %v63_v56 = vld [vmem:[%s893_s0 + $0x188] sm:$0xff] }
  0x1b   :  { %296 = vst [vmem:[%s896_s3 + $0x90] sm:$0xff] %v232_v35  ;;  %v117_v11 = vmul.f32 %v374_v1, %v49_v62  ;;  %v242_v13 = vmax.f32 %v178_v60, 0.0  ;;  %v182_v14 = vadd.f32 %v379_v2, %v114_v61  ;;  %v118_v15 = vmul.f32 %v374_v1, %v50_v4  ;;  %v64_v60 = vld [vmem:[%s893_s0 + $0x190] sm:$0xff] }
  0x1c   :  { %297 = vst [vmem:[%s896_s3 + $0x98] sm:$0xff] %v233_v39  ;;  %v243_v17 = vmax.f32 %v179_v0, 0.0  ;;  %v183_v18 = vadd.f32 %v379_v2, %v115_v3  ;;  %v119_v19 = vmul.f32 %v374_v1, %v51_v8  ;;  %v244_v21 = vmax.f32 %v180_v6, 0.0  ;;  %v65_v0 = vld [vmem:[%s893_s0 + $0x198] sm:$0xff] }
  0x1d   :  { %298 = vst [vmem:[%s896_s3 + $0xa0] sm:$0xff] %v234_v43  ;;  %v184_v22 = vadd.f32 %v379_v2, %v116_v7  ;;  %v120_v23 = vmul.f32 %v374_v1, %v52_v12  ;;  %v245_v25 = vmax.f32 %v181_v10, 0.0  ;;  %v185_v26 = vadd.f32 %v379_v2, %v117_v11  ;;  %v77_v3 = vld [vmem:[%s893_s0 + $0x1f8] sm:$0xff]  ;;  %v66_v7 = vld [vmem:[%s893_s0 + $0x1a0] sm:$0xff]  ;;  %v67_v11 = vld [vmem:[%s893_s0 + $0x1a8] sm:$0xff] }
  0x1e   :  { %299 = vst [vmem:[%s896_s3 + $0xa8] sm:$0xff] %v235_v47  ;;  %v121_v27 = vmul.f32 %v374_v1, %v53_v16  ;;  %v246_v29 = vmax.f32 %v182_v14, 0.0  ;;  %v186_v30 = vadd.f32 %v379_v2, %v118_v15  ;;  %v122_v31 = vmul.f32 %v374_v1, %v54_v20  ;;  %v68_v15 = vld [vmem:[%s893_s0 + $0x1b0] sm:$0xff]  ;;  %v69_v20 = vld [vmem:[%s893_s0 + $0x1b8] sm:$0xff] }
  0x1f   :  { %300 = vst [vmem:[%s896_s3 + $0xb0] sm:$0xff] %v236_v51  ;;  %v247_v33 = vmax.f32 %v183_v18, 0.0  ;;  %v187_v34 = vadd.f32 %v379_v2, %v119_v19  ;;  %v123_v35 = vmul.f32 %v374_v1, %v55_v24  ;;  %v248_v37 = vmax.f32 %v184_v22, 0.0  ;;  %v70_v24 = vld [vmem:[%s893_s0 + $0x1c0] sm:$0xff] }
  0x20   :  { %301 = vst [vmem:[%s896_s3 + $0xb8] sm:$0xff] %v237_v55  ;;  %v188_v38 = vadd.f32 %v379_v2, %v120_v23  ;;  %v124_v39 = vmul.f32 %v374_v1, %v56_v28  ;;  %v249_v41 = vmax.f32 %v185_v26, 0.0  ;;  %v189_v42 = vadd.f32 %v379_v2, %v121_v27 }
  0x21   :  { %302 = vst [vmem:[%s896_s3 + $0xc0] sm:$0xff] %v238_v59  ;;  %v125_v43 = vmul.f32 %v374_v1, %v57_v32  ;;  %v250_v45 = vmax.f32 %v186_v30, 0.0  ;;  %v190_v46 = vadd.f32 %v379_v2, %v122_v31  ;;  %v126_v47 = vmul.f32 %v374_v1, %v58_v36 }
  0x22   :  { %303 = vst [vmem:[%s896_s3 + $0xc8] sm:$0xff] %v239_v63  ;;  %v251_v49 = vmax.f32 %v187_v34, 0.0  ;;  %v191_v50 = vadd.f32 %v379_v2, %v123_v35  ;;  %v127_v51 = vmul.f32 %v374_v1, %v59_v40  ;;  %v252_v53 = vmax.f32 %v188_v38, 0.0 }
  0x23   :  { %304 = vst [vmem:[%s896_s3 + $0xd0] sm:$0xff] %v240_v5  ;;  %v192_v54 = vadd.f32 %v379_v2, %v124_v39  ;;  %v128_v55 = vmul.f32 %v374_v1, %v60_v44  ;;  %v253_v57 = vmax.f32 %v189_v42, 0.0  ;;  %v193_v58 = vadd.f32 %v379_v2, %v125_v43 }
  0x24   :  { %305 = vst [vmem:[%s896_s3 + $0xd8] sm:$0xff] %v241_v9  ;;  %v129_v59 = vmul.f32 %v374_v1, %v61_v48  ;;  %v254_v61 = vmax.f32 %v190_v46, 0.0  ;;  %v194_v62 = vadd.f32 %v379_v2, %v126_v47  ;;  %v130_v63 = vmul.f32 %v374_v1, %v62_v52 }
  0x25   :  { %306 = vst [vmem:[%s896_s3 + $0xe0] sm:$0xff] %v242_v13  ;;  %v255_v4 = vmax.f32 %v191_v50, 0.0  ;;  %v195_v5 = vadd.f32 %v379_v2, %v127_v51  ;;  %v131_v6 = vmul.f32 %v374_v1, %v63_v56  ;;  %v256_v8 = vmax.f32 %v192_v54, 0.0 }
  0x26   :  { %307 = vst [vmem:[%s896_s3 + $0xe8] sm:$0xff] %v243_v17  ;;  %v196_v9 = vadd.f32 %v379_v2, %v128_v55  ;;  %v132_v10 = vmul.f32 %v374_v1, %v64_v60  ;;  %v257_v12 = vmax.f32 %v193_v58, 0.0  ;;  %v197_v13 = vadd.f32 %v379_v2, %v129_v59 }
  0x27   :  { %308 = vst [vmem:[%s896_s3 + $0xf0] sm:$0xff] %v244_v21  ;;  %v133_v14 = vmul.f32 %v374_v1, %v65_v0  ;;  %v145_v16 = vmul.f32 %v374_v1, %v77_v3  ;;  %v258_v17 = vmax.f32 %v194_v62, 0.0  ;;  %v198_v18 = vadd.f32 %v379_v2, %v130_v63 }
  0x28   :  { %309 = vst [vmem:[%s896_s3 + $0xf8] sm:$0xff] %v245_v25  ;;  %v134_v19 = vmul.f32 %v374_v1, %v66_v7  ;;  %v259_v21 = vmax.f32 %v195_v5, 0.0  ;;  %v199_v22 = vadd.f32 %v379_v2, %v131_v6  ;;  %v135_v23 = vmul.f32 %v374_v1, %v67_v11 }
  0x29   :  { %310 = vst [vmem:[%s896_s3 + $0x100] sm:$0xff] %v246_v29  ;;  %v784_v25 = vadd.f32 %v379_v2, %v145_v16  ;;  %v260_v26 = vmax.f32 %v196_v9, 0.0  ;;  %v200_v27 = vadd.f32 %v379_v2, %v132_v10  ;;  %v136_v28 = vmul.f32 %v374_v1, %v68_v15  ;;  %v71_v29 = vld [vmem:[%s893_s0 + $0x1c8] sm:$0xff] }
  0x2a   :  { %311 = vst [vmem:[%s896_s3 + $0x108] sm:$0xff] %v247_v33  ;;  %v261_v30 = vmax.f32 %v197_v13, 0.0  ;;  %v201_v31 = vadd.f32 %v379_v2, %v133_v14  ;;  %v137_v32 = vmul.f32 %v374_v1, %v69_v20  ;;  %v72_v33 = vld [vmem:[%s893_s0 + $0x1d0] sm:$0xff]  ;;  %v262_v34 = vmax.f32 %v198_v18, 0.0 }
  0x2b   :  { %312 = vst [vmem:[%s896_s3 + $0x110] sm:$0xff] %v248_v37  ;;  %v202_v35 = vadd.f32 %v379_v2, %v134_v19  ;;  %v138_v36 = vmul.f32 %v374_v1, %v70_v24  ;;  %v73_v37 = vld [vmem:[%s893_s0 + $0x1d8] sm:$0xff]  ;;  %v263_v38 = vmax.f32 %v199_v22, 0.0  ;;  %v203_v39 = vadd.f32 %v379_v2, %v135_v23 }
  0x2c   :  { %313 = vst [vmem:[%s896_s3 + $0x118] sm:$0xff] %v249_v41  ;;  %v139_v40 = vmul.f32 %v374_v1, %v71_v29  ;;  %v74_v41 = vld [vmem:[%s893_s0 + $0x1e0] sm:$0xff]  ;;  %v264_v42 = vmax.f32 %v200_v27, 0.0  ;;  %v204_v43 = vadd.f32 %v379_v2, %v136_v28  ;;  %v140_v44 = vmul.f32 %v374_v1, %v72_v33 }
  0x2d   :  { %314 = vst [vmem:[%s896_s3 + $0x120] sm:$0xff] %v250_v45  ;;  %v75_v45 = vld [vmem:[%s893_s0 + $0x1e8] sm:$0xff]  ;;  %v265_v46 = vmax.f32 %v201_v31, 0.0  ;;  %v205_v47 = vadd.f32 %v379_v2, %v137_v32  ;;  %v141_v48 = vmul.f32 %v374_v1, %v73_v37  ;;  %v266_v50 = vmax.f32 %v202_v35, 0.0 }
  0x2e   :  { %315 = vst [vmem:[%s896_s3 + $0x128] sm:$0xff] %v251_v49  ;;  %v76_v49 = vld [vmem:[%s893_s0 + $0x1f0] sm:$0xff]  ;;  %v206_v51 = vadd.f32 %v379_v2, %v138_v36  ;;  %v142_v52 = vmul.f32 %v374_v1, %v74_v41  ;;  %v207_v54 = vadd.f32 %v379_v2, %v139_v40  ;;  %v143_v55 = vmul.f32 %v374_v1, %v75_v45 }
  0x2f   :  { %316 = vst [vmem:[%s896_s3 + $0x130] sm:$0xff] %v252_v53  ;;  %v267_v53 = vmax.f32 %v203_v39, 0.0  ;;  %v268_v56 = vmax.f32 %v204_v43, 0.0  ;;  %v144_v58 = vmul.f32 %v374_v1, %v76_v49  ;;  %v269_v59 = vmax.f32 %v205_v47, 0.0 }
  0x30   :  { %317 = vst [vmem:[%s896_s3 + $0x138] sm:$0xff] %v253_v57  ;;  %v208_v57 = vadd.f32 %v379_v2, %v140_v44  ;;  %v209_v60 = vadd.f32 %v379_v2, %v141_v48  ;;  %v210_v62 = vadd.f32 %v379_v2, %v142_v52  ;;  %v271_v63 = vmax.f32 %v207_v54, 0.0 }
  0x31   :  { %318 = vst [vmem:[%s896_s3 + $0x140] sm:$0xff] %v254_v61  ;;  %v270_v61 = vmax.f32 %v206_v51, 0.0  ;;  %v211_v1 = vadd.f32 %v379_v2, %v143_v55  ;;  %v212_v3 = vadd.f32 %v379_v2, %v144_v58  ;;  %v277_v7 = vmax.f32 %v784_v25, 0.0 }
  0x32   :  { %319 = vst [vmem:[%s896_s3 + $0x148] sm:$0xff] %v255_v4  ;;  %v272_v0 = vmax.f32 %v208_v57, 0.0  ;;  %v273_v4 = vmax.f32 %v209_v60, 0.0  ;;  %v274_v5 = vmax.f32 %v210_v62, 0.0 }
  0x33   :  { %320 = vst [vmem:[%s896_s3 + $0x150] sm:$0xff] %v256_v8  ;;  %v275_v6 = vmax.f32 %v211_v1, 0.0  ;;  %v276_v2 = vmax.f32 %v212_v3, 0.0 }
  0x34   :  { %321 = vst [vmem:[%s896_s3 + $0x158] sm:$0xff] %v257_v12 }
  0x35   :  { %322 = vst [vmem:[%s896_s3 + $0x160] sm:$0xff] %v258_v17 }
  0x36   :  { %323 = vst [vmem:[%s896_s3 + $0x168] sm:$0xff] %v259_v21 }
  0x37   :  { %324 = vst [vmem:[%s896_s3 + $0x170] sm:$0xff] %v260_v26 }
  0x38   :  { %325 = vst [vmem:[%s896_s3 + $0x178] sm:$0xff] %v261_v30 }
  0x39   :  { %326 = vst [vmem:[%s896_s3 + $0x180] sm:$0xff] %v262_v34 }
  0x3a   :  { %327 = vst [vmem:[%s896_s3 + $0x188] sm:$0xff] %v263_v38 }
  0x3b   :  { %328 = vst [vmem:[%s896_s3 + $0x190] sm:$0xff] %v264_v42 }
  0x3c   :  { %329 = vst [vmem:[%s896_s3 + $0x198] sm:$0xff] %v265_v46 }
  0x3d   :  { %330 = vst [vmem:[%s896_s3 + $0x1a0] sm:$0xff] %v266_v50 }
  0x3e   :  { %331 = vst [vmem:[%s896_s3 + $0x1a8] sm:$0xff] %v267_v53 }
  0x3f   :  { %332 = vst [vmem:[%s896_s3 + $0x1b0] sm:$0xff] %v268_v56 }
  0x40   :  { %333 = vst [vmem:[%s896_s3 + $0x1b8] sm:$0xff] %v269_v59 }
  0x41   :  { %334 = vst [vmem:[%s896_s3 + $0x1c0] sm:$0xff] %v270_v61 }
  0x42   :  { %335 = vst [vmem:[%s896_s3 + $0x1c8] sm:$0xff] %v271_v63 }
  0x43   :  { %336 = vst [vmem:[%s896_s3 + $0x1d0] sm:$0xff] %v272_v0 }
  0x44   :  { %337 = vst [vmem:[%s896_s3 + $0x1d8] sm:$0xff] %v273_v4 }
  0x45   :  { %338 = vst [vmem:[%s896_s3 + $0x1e0] sm:$0xff] %v274_v5 }
  0x46   :  { %339 = vst [vmem:[%s896_s3 + $0x1e8] sm:$0xff] %v275_v6 }
  0x47   :  { %340 = vst [vmem:[%s896_s3 + $0x1f0] sm:$0xff] %v276_v2 }
  0x48   :  { %341 = vst [vmem:[%s896_s3 + $0x1f8] sm:$0xff] %v277_v7 }

// kernel: decoder_block.6
= control target key start
LH: loop header
LB: loop body
LE: loop exit
PB: predicated region body
PF: predicated region fallthrough
CT: control target
= control target key end

     0   :  { %s1793_s15 = smov 0   ;;  %s2094_s0 = inlined_call_operand.vmem [shape: bf16[2,18,18,128], index: 0, kind: input, shape index: {}]   ;;  %s2095_s1 = inlined_call_operand.vmem [shape: bf16[9,128,128], index: 1, kind: input, shape index: {}]   ;;  %s2096_s2 = inlined_call_operand.vmem [shape: f32[1,128], index: 2, kind: input, shape index: {}]   ;;  %s2097_s3 = inlined_call_operand.vmem [shape: f32[2,16,16,128], index: 3, kind: output, shape index: {0}]   ;;  %s2098_s4 = inlined_call_operand.vmem [shape: f32[2,2,128], index: 4, kind: output, shape index: {1}]  }
   0x1 LB: > { %s1178_s16 = sadd.s32 4294967295, %s1754_s15   ;;  %p1182_p0 = scmp.ge.s32.totalorder %s1754_s15, 1  ;;  %s1754_s15 = sphi %s1793_s15, %s15_s15  }
   0x2   : > { %p165_p1 = scmp.lt.s32.totalorder %s1754_s15, 3 }
   0x4   : > { %p166_p2 = pnand %p1182_p0, %p165_p1 }
   0x5   : > { %p195_p3 = scmp.lt.s32.totalorder (!%p166_p2), %s1178_s16, 1  ;;  %s1820_s29 = smov (!%p166_p2), 0  }
   0x6   : > { %169 = sbr.rel (%p166_p2) target bundleno = 268 (0x10c), region = 32 }
   0xb   : > { %s2102_s16 = smov (!%p195_p3, %s1178_s16), 1  ;;  %v1816_v0 = vmov 0.0   ;;  %v1818_v1 = vmov 0.0  }
   0xc   : > { %s1702_s17 = smul.u32 216, %s2102_s16  ;;  %s1625_s18 = sshll.u32 %s2102_s16, 8 }
   0xd   : > { %s1804_s21 = scalar_lea.vmem %s2097_s3, %s1625_s18  ;;  %s1186_s22 = sshll.u32 %s2102_s16, 1 }
   0xe   : > { %s1809_s25 = scalar_lea.vmem %s2094_s0, %s1702_s17  ;;  %s1814_s28 = scalar_lea.vmem %s2098_s4, %s1186_s22 }
   0xf LB: >> { %v1643_v2 = vld [vmem:[%s2095_s1 + $0x78] sm:$0xff]  ;;  %v1642_v6 = vld [vmem:[%s2095_s1 + $0x70] sm:$0xff]  ;;  %v1641_v10 = vld [vmem:[%s2095_s1 + $0x68] sm:$0xff]  ;;  %s1626_s7 = smul.u32 12, %s1766_s29  ;;  %vm264_vm0 = vsmask.f32 7424  ;;  %s1766_s29 = sphi %s1820_s29, %s214_s29   ;;  %v1762_v1 = vphi %v1818_v1, %v2100_v1   ;;  %v1758_v0 = vphi %v1816_v0, %v2099_v0  }
  0x10   : >> { %v1651_v3 = vld [vmem:[%s2095_s1 + $0xb8] sm:$0xff]  ;;  %326 = vmatpush.bf16.msra.mxu0 %v1643_v2  ;;  %v1650_v7 = vld [vmem:[%s2095_s1 + $0xb0] sm:$0xff]  ;;  %v1649_v11 = vld [vmem:[%s2095_s1 + $0xa8] sm:$0xff]  ;;  %vm420_vm1 = vcmask 1046528   ;;  %s1622_s8 = sshll.u32 %s1766_s29, 4  ;;  %s214_s29 = sadd.s32 1, %s1766_s29  }
  0x11   : >> { %v1635_v4 = vld [vmem:[%s2095_s1 + $0x38] sm:$0xff]  ;;  %473 = vmatpush.bf16.msra.mxu2 %v1651_v3  ;;  %v1634_v8 = vld [vmem:[%s2095_s1 + $0x30] sm:$0xff]  ;;  %v1633_v12 = vld [vmem:[%s2095_s1 + $0x28] sm:$0xff]  ;;  %s1881_s17 = scalar_lea.vmem %s1809_s25, %s1626_s7  ;;  %s1048_s9 = scalar_lea.vmem %s1804_s21, %s1622_s8 }
  0x12   : >> { %v1660_v5 = vld [vmem:[%s2095_s1 + $0xf8] sm:$0xff]  ;;  %389 = vmatpush.bf16.msra.mxu1 %v1635_v4  ;;  %v1659_v9 = vld [vmem:[%s2095_s1 + $0xf0] sm:$0xff]  ;;  %v1658_v13 = vld [vmem:[%s2095_s1 + $0xe8] sm:$0xff]  ;;  %p211_p4 = scmp.ge.s32.totalorder %s214_s29, 16  }
  0x13   : >> { %567 = vmatpush.bf16.msra.mxu3 %v1660_v5  ;;  %v1640_v14 = vld [vmem:[%s2095_s1 + $0x60] sm:$0xff]  ;;  %v1639_v18 = vld [vmem:[%s2095_s1 + $0x58] sm:$0xff]  ;;  %v222_v23 = vld [vmem:[%s1881_s17 + $0x8] sm:$0x1] }
  0x14   : >> { %327 = vmatpush.bf16.msra.mxu0 %v1642_v6  ;;  %v1648_v15 = vld [vmem:[%s2095_s1 + $0xa0] sm:$0xff]  ;;  %v1647_v19 = vld [vmem:[%s2095_s1 + $0x98] sm:$0xff]  ;;  %v261_v24 = vunpack.c.l.b16 %v222_v23  ;;  %v1638_v25 = vld [vmem:[%s2095_s1 + $0x50] sm:$0xff] }
  0x15   : >> { %474 = vmatpush.bf16.msra.mxu2 %v1650_v7  ;;  %v1632_v16 = vld [vmem:[%s2095_s1 + $0x20] sm:$0xff]  ;;  %v1631_v20 = vld [vmem:[%s2095_s1 + $0x18] sm:$0xff]  ;;  %v1646_v26 = vld [vmem:[%s2095_s1 + $0x90] sm:$0xff] }
  0x16   : >> { %390 = vmatpush.bf16.msra.mxu1 %v1634_v8  ;;  %v1657_v17 = vld [vmem:[%s2095_s1 + $0xe0] sm:$0xff]  ;;  %v1656_v21 = vld [vmem:[%s2095_s1 + $0xd8] sm:$0xff]  ;;  %v1630_v27 = vld [vmem:[%s2095_s1 + $0x10] sm:$0xff]  ;;  %v263_v29 = vpack.c.b16 %v261_v24, %v261_v24 }
  0x17   : >> { %568 = vmatpush.bf16.msra.mxu3 %v1659_v9  ;;  %v1627_v22 = vld [vmem:[%s1881_s17] sm:$0xff]  ;;  %v1655_v28 = vld [vmem:[%s2095_s1 + $0xd0] sm:$0xff]  ;;  %v1637_v31 = vld [vmem:[%s2095_s1 + $0x48] sm:$0xff] }
  0x18   : >> { %328 = vmatpush.bf16.msra.mxu0 %v1641_v10  ;;  %v268_v30 = vshll.u32 %v1627_v22, 16  ;;  %v1645_v32 = vld [vmem:[%s2095_s1 + $0x88] sm:$0xff]  ;;  %v266_v35 = vshrl.u32 %v1627_v22, 16  ;;  %v273_v37 = vshll.u32 %v263_v29, 16  ;;  %v1636_v38 = vld [vmem:[%s2095_s1 + $0x40] sm:$0xff]  ;;  %v1668_v40 = vld [vmem:[%s2095_s1 + $0x138] sm:$0xff] }
  0x19   : >> { %475 = vmatpush.bf16.msra.mxu2 %v1649_v11  ;;  %v1629_v33 = vld [vmem:[%s2095_s1 + $0x8] sm:$0xff]  ;;  %v1644_v39 = vld [vmem:[%s2095_s1 + $0x80] sm:$0xff]  ;;  %v1685_v41 = vld [vmem:[%s2095_s1 + $0x1b8] sm:$0xff]  ;;  %v421_v44 = vrot.slane %v1627_v22, 1  ;;  %v422_v45 = vrot.slane %v263_v29, 1 }
  0x1a   : >> { %391 = vmatpush.bf16.msra.mxu1 %v1633_v12  ;;  %v1654_v34 = vld [vmem:[%s2095_s1 + $0xc8] sm:$0xff]  ;;  %v270_v36 = vrot.slane %v268_v30, 1  ;;  %v275_v43 = vrot.slane %v273_v37, 1  ;;  %v1628_v46 = vld [vmem:[%s2095_s1] sm:$0xff]  ;;  %v1676_v48 = vld [vmem:[%s2095_s1 + $0x178] sm:$0xff] }
  0x1b   : >> { %569 = vmatpush.bf16.msra.mxu3 %v1658_v13  ;;  %v1653_v47 = vld [vmem:[%s2095_s1 + $0xc0] sm:$0xff]  ;;  %v1693_v49 = vld [vmem:[%s2095_s1 + $0x1f8] sm:$0xff]  ;;  %v1667_v50 = vld [vmem:[%s2095_s1 + $0x130] sm:$0xff]  ;;  %v423_v53 = vsel %vm420_vm1, %v421_v44, %v422_v45 }
  0x1c   : >> { %329 = vmatpush.bf16.msra.mxu0 %v1640_v14  ;;  %v271_v42 = vor.u32 %v270_v36, %v266_v35  ;;  %v1684_v51 = vld [vmem:[%s2095_s1 + $0x1b0] sm:$0xff]  ;;  %v1666_v57 = vld [vmem:[%s2095_s1 + $0x128] sm:$0xff]  ;;  %v1665_v61 = vld [vmem:[%s2095_s1 + $0x120] sm:$0xff] }
  0x1d   : >> { %476 = vmatpush.bf16.msra.mxu2 %v1648_v15  ;;  %v1954_v54 = vld [vmem:[%s1881_s17 + $0xc] sm:$0xff]  ;;  %v1682_v62 = vld [vmem:[%s2095_s1 + $0x1a0] sm:$0xff]  ;;  %v1322_v63 = vld [vmem:[%s1881_s17 + $0x14] sm:$0x1] }
  0x1e   : >> { %392 = vmatpush.bf16.msra.mxu1 %v1632_v16  ;;  %v276_v52 = vsel %vm264_vm0, %v271_v42, %v275_v43  ;;  %v1675_v55 = vld [vmem:[%s2095_s1 + $0x170] sm:$0xff]  ;;  %v1683_v58 = vld [vmem:[%s2095_s1 + $0x1a8] sm:$0xff]  ;;  %v1673_v2 = vld [vmem:[%s2095_s1 + $0x160] sm:$0xff]  ;;  %v601_v7 = vunpack.c.l.b16 %v1322_v63  ;;  %v606_v15 = vshll.u32 %v1954_v54, 16  ;;  %v697_v37 = vrot.slane %v1954_v54, 1 }
  0x1f   : >> { %570 = vmatpush.bf16.msra.mxu3 %v1657_v17  ;;  %v1692_v56 = vld [vmem:[%s2095_s1 + $0x1f0] sm:$0xff]  ;;  %v1674_v59 = vld [vmem:[%s2095_s1 + $0x168] sm:$0xff]  ;;  %v1690_v3 = vld [vmem:[%s2095_s1 + $0x1e0] sm:$0xff] }
  0x20   : >> { %330 = vmatpush.bf16.msra.mxu0 %v1639_v18  ;;  %v1691_v60 = vld [vmem:[%s2095_s1 + $0x1e8] sm:$0xff]  ;;  %v1473_v4 = vld [vmem:[%s1881_s17 + $0x20] sm:$0x1]  ;;  %v1664_v5 = vld [vmem:[%s2095_s1 + $0x118] sm:$0xff]  ;;  %v602_v14 = vpack.c.b16 %v601_v7, %v601_v7  ;;  %v608_v23 = vrot.slane %v606_v15, 1 }
  0x21   : >> { %477 = vmatpush.bf16.msra.mxu2 %v1647_v19  ;;  %v1681_v6 = vld [vmem:[%s2095_s1 + $0x198] sm:$0xff]  ;;  %v877_v11 = vunpack.c.l.b16 %v1473_v4  ;;  %v1663_v12 = vld [vmem:[%s2095_s1 + $0x110] sm:$0xff]  ;;  %v1661_v30 = vld [vmem:[%s2095_s1 + $0x100] sm:$0xff] }
  0x22   : >> { %393 = vmatpush.bf16.msra.mxu1 %v1631_v20  ;;  %v1672_v8 = vld [vmem:[%s2095_s1 + $0x158] sm:$0xff]  ;;  %v1680_v13 = vld [vmem:[%s2095_s1 + $0x190] sm:$0xff]  ;;  %v1662_v20 = vld [vmem:[%s2095_s1 + $0x108] sm:$0xff]  ;;  %v611_v24 = vshll.u32 %v602_v14, 16 }
  0x23   : >> { %571 = vmatpush.bf16.msra.mxu3 %v1656_v21  ;;  %v1689_v9 = vld [vmem:[%s2095_s1 + $0x1d8] sm:$0xff]  ;;  %v1671_v16 = vld [vmem:[%s2095_s1 + $0x150] sm:$0xff]  ;;  %v878_v18 = vpack.c.b16 %v877_v11, %v877_v11  ;;  %v1679_v21 = vld [vmem:[%s2095_s1 + $0x188] sm:$0xff] }
  0x24   : >> { %331 = vmatpush.bf16.msra.mxu0 %v1638_v25  ;;  %v2002_v10 = vld [vmem:[%s1881_s17 + $0x18] sm:$0xff]  ;;  %v1688_v17 = vld [vmem:[%s2095_s1 + $0x1d0] sm:$0xff]  ;;  %v1670_v25 = vld [vmem:[%s2095_s1 + $0x148] sm:$0xff] }
  0x25   : >> { %478 = vmatpush.bf16.msra.mxu2 %v1646_v26  ;;  %v882_v19 = vshll.u32 %v2002_v10, 16  ;;  %v1687_v26 = vld [vmem:[%s2095_s1 + $0x1c8] sm:$0xff]  ;;  %v887_v29 = vshll.u32 %v878_v18, 16  ;;  %v1669_v35 = vld [vmem:[%s2095_s1 + $0x140] sm:$0xff]  ;;  %v1700_v44 = vld [vmem:[%s2095_s1 + $0x230] sm:$0xff] }
  0x26   : >> { %394 = vmatpush.bf16.msra.mxu1 %v1630_v27  ;;  %v880_v27 = vshrl.u32 %v2002_v10, 16  ;;  %v1686_v36 = vld [vmem:[%s2095_s1 + $0x1c0] sm:$0xff]  ;;  %v1699_v45 = vld [vmem:[%s2095_s1 + $0x228] sm:$0xff] }
  0x27   : >> { %572 = vmatpush.bf16.msra.mxu3 %v1655_v28  ;;  %v884_v28 = vrot.slane %v882_v19, 1 }
  0x28   : >> { %332 = vmatpush.bf16.msra.mxu0 %v1637_v31  ;;  %v1678_v31 = vld [vmem:[%s2095_s1 + $0x180] sm:$0xff] }
  0x29   : >> { %479 = vmatpush.bf16.msra.mxu2 %v1645_v32 }
  0x2a   : >> { %395 = vmatpush.bf16.msra.mxu1 %v1629_v33  ;;  %v613_v33 = vrot.slane %v611_v24, 1 }
  0x2b   : >> { %573 = vmatpush.bf16.msra.mxu3 %v1654_v34  ;;  %v1701_v34 = vld [vmem:[%s2095_s1 + $0x238] sm:$0xff] }
  0x2c   : >> { %333 = vmatpush.bf16.msra.mxu0 %v1636_v38  ;;  %v698_v38 = vrot.slane %v602_v14, 1 }
  0x2d   : >> { %480 = vmatpush.bf16.msra.mxu2 %v1644_v39  ;;  %v885_v39 = vor.u32 %v884_v28, %v880_v27 }
  0x2e   : >> { %396 = vmatpush.bf16.msra.mxu1 %v1628_v46  ;;  %v699_v42 = vsel %vm420_vm1, %v697_v37, %v698_v38  ;;  %v1698_v46 = vld [vmem:[%s2095_s1 + $0x220] sm:$0xff] }
  0x2f   : >> { %574 = vmatpush.bf16.msra.mxu3 %v1653_v47  ;;  %334 = vmatmul.bf16.vlgmr.msra.gmra.mxu0 %v276_v52  ;;  %v1697_v47 = vld [vmem:[%s2095_s1 + $0x218] sm:$0xff]  ;;  %v974_v52 = vrot.slane %v878_v18, 1 }
  0x30   : >> { %664 = vmatpush.bf16.msrb.mxu0 %v1668_v40  ;;  %481 = vmatmul.bf16.vlgmr.msra.gmra.mxu2 %v423_v53  ;;  %v889_v40 = vrot.slane %v887_v29, 1 }
  0x31   : >> { %843 = vmatpush.bf16.msrb.mxu2 %v1685_v41  ;;  %397 = vmatmul.bf16.vlgmr.msra.gmra.mxu1 %v1627_v22  ;;  %v604_v22 = vshrl.u32 %v1954_v54, 16 }
  0x32   : >> { %749 = vmatpush.bf16.msrb.mxu1 %v1676_v48  ;;  %575 = vmatmul.bf16.vlgmr.msra.gmra.mxu3 %v1954_v54  ;;  %v890_v43 = vsel %vm264_vm0, %v885_v39, %v889_v40  ;;  %v1696_v48 = vld [vmem:[%s2095_s1 + $0x210] sm:$0xff] }
  0x33   : >> { %940 = vmatpush.bf16.msrb.mxu3 %v1693_v49  ;;  %v609_v32 = vor.u32 %v608_v23, %v604_v22  ;;  %v1695_v49 = vld [vmem:[%s2095_s1 + $0x208] sm:$0xff] }
  0x34   : >> { %665 = vmatpush.bf16.msrb.mxu0 %v1667_v50  ;;  %v1694_v50 = vld [vmem:[%s2095_s1 + $0x200] sm:$0xff] }
  0x35   : >> { %844 = vmatpush.bf16.msrb.mxu2 %v1684_v51  ;;  %v614_v41 = vsel %vm264_vm0, %v609_v32, %v613_v33  ;;  %v973_v51 = vrot.slane %v2002_v10, 1 }
  0x36   : >> { %750 = vmatpush.bf16.msrb.mxu1 %v1675_v55 }
  0x37   : >> { %941 = vmatpush.bf16.msrb.mxu3 %v1692_v56  ;;  %v975_v53 = vsel %vm420_vm1, %v973_v51, %v974_v52 }
  0x38   : >> { %666 = vmatpush.bf16.msrb.mxu0 %v1666_v57 }
  0x39   : >> { %845 = vmatpush.bf16.msrb.mxu2 %v1683_v58 }
  0x3a   : >> { %751 = vmatpush.bf16.msrb.mxu1 %v1674_v59 }
  0x3b   : >> { %942 = vmatpush.bf16.msrb.mxu3 %v1691_v60 }
  0x3c   : >> { %667 = vmatpush.bf16.msrb.mxu0 %v1665_v61 }
  0x3d   : >> { %846 = vmatpush.bf16.msrb.mxu2 %v1682_v62 }
  0x3e   : >> { %752 = vmatpush.bf16.msrb.mxu1 %v1673_v2 }
  0x3f   : >> { %943 = vmatpush.bf16.msrb.mxu3 %v1690_v3 }
  0x40   : >> { %668 = vmatpush.bf16.msrb.mxu0 %v1664_v5 }
  0x41   : >> { %847 = vmatpush.bf16.msrb.mxu2 %v1681_v6 }
  0x42   : >> { %753 = vmatpush.bf16.msrb.mxu1 %v1672_v8 }
  0x43   : >> { %944 = vmatpush.bf16.msrb.mxu3 %v1689_v9 }
  0x44   : >> { %669 = vmatpush.bf16.msrb.mxu0 %v1663_v12 }
  0x45   : >> { %848 = vmatpush.bf16.msrb.mxu2 %v1680_v13 }
  0x46   : >> { %754 = vmatpush.bf16.msrb.mxu1 %v1671_v16 }
  0x47   : >> { %945 = vmatpush.bf16.msrb.mxu3 %v1688_v17  ;;  %v1735_v17 = vld [vmem:[%s2096_s2] ss:$0 sm:$0xff] }
  0x48   : >> { %670 = vmatpush.bf16.msrb.mxu0 %v1662_v20 }
  0x49   : >> { %849 = vmatpush.bf16.msrb.mxu2 %v1679_v21 }
  0x4a   : >> { %755 = vmatpush.bf16.msrb.mxu1 %v1670_v25 }
  0x4b   : >> { %946 = vmatpush.bf16.msrb.mxu3 %v1687_v26 }
  0x4c   : >> { %671 = vmatpush.bf16.msrb.mxu0 %v1661_v30 }
  0x4d   : >> { %850 = vmatpush.bf16.msrb.mxu2 %v1678_v31 }
  0x4e   : >> { %756 = vmatpush.bf16.msrb.mxu1 %v1669_v35 }
  0x4f   : >> { %947 = vmatpush.bf16.msrb.mxu3 %v1686_v36  ;;  %672 = vmatmul.bf16.vlgmr.msrb.gmra.mxu0 %v614_v41 }
  0x50   : >> { %1025 = vmatpush.bf16.msra.mxu0 %v1701_v34  ;;  %851 = vmatmul.bf16.vlgmr.msrb.gmra.mxu2 %v2002_v10 }
  0x51   : >> { %757 = vmatmul.bf16.vlgmr.msrb.gmra.mxu1 %v699_v42 }
  0x52   : >> { %948 = vmatmul.bf16.vlgmr.msrb.gmra.mxu3 %v890_v43 }
  0x54   : >> { %1026 = vmatpush.bf16.msra.mxu0 %v1700_v44 }
  0x58   : >> { %1027 = vmatpush.bf16.msra.mxu0 %v1699_v45 }
  0x5c   : >> { %1028 = vmatpush.bf16.msra.mxu0 %v1698_v46 }
  0x60   : >> { %1029 = vmatpush.bf16.msra.mxu0 %v1697_v47 }
  0x64   : >> { %1030 = vmatpush.bf16.msra.mxu0 %v1696_v48 }
  0x68   : >> { %1031 = vmatpush.bf16.msra.mxu0 %v1695_v49 }
  0x6c   : >> { %1032 = vmatpush.bf16.msra.mxu0 %v1694_v50 }
  0x6f   : >> { %1033 = vmatmul.bf16.vlgmr.msra.gmra.mxu0 %v975_v53 }
  0xac   : >> { %v335_v54 = vpop.f32.mrf.mxu0 }
  0xae   : >> { %v398_v55 = vpop.f32.mrf.mxu1 }
  0xaf   : >> { %v399_v59 = vadd.f32 %v398_v55, %v335_v54 }
  0xb3   : >> { %v482_v56 = vpop.f32.mrf.mxu2 }
  0xb4   : >> { %v337_v57 = vpop.f32.mrf.mxu0  ;;  %v487_v61 = vadd.f32 %v482_v56, %v399_v59 }
  0xb5   : >> { %v576_v58 = vpop.f32.mrf.mxu3 }
  0xb6   : >> { %v400_v60 = vpop.f32.mrf.mxu1  ;;  %v581_v2 = vadd.f32 %v576_v58, %v487_v61 }
  0xb7   : >> { %v401_v4 = vadd.f32 %v400_v60, %v337_v57 }
  0xbb   : >> { %v484_v62 = vpop.f32.mrf.mxu2 }
  0xbc   : >> { %v488_v8 = vadd.f32 %v484_v62, %v401_v4 }
  0xbd   : >> { %v578_v3 = vpop.f32.mrf.mxu3 }
  0xbe   : >> { %v582_v12 = vadd.f32 %v578_v3, %v488_v8 }
  0xcc   : >> { %v673_v63 = vpop.f32.mrf.mxu0 }
  0xcd   : >> { %v678_v5 = vadd.f32 %v673_v63, %v581_v2 }
  0xce   : >> { %v758_v6 = vpop.f32.mrf.mxu1 }
  0xcf   : >> { %v763_v9 = vadd.f32 %v758_v6, %v678_v5 }
  0xd3   : >> { %v852_v7 = vpop.f32.mrf.mxu2 }
  0xd4   : >> { %v675_v10 = vpop.f32.mrf.mxu0  ;;  %v857_v13 = vadd.f32 %v852_v7, %v763_v9 }
  0xd5   : >> { %v949_v11 = vpop.f32.mrf.mxu3  ;;  %v679_v14 = vadd.f32 %v675_v10, %v582_v12 }
  0xd6   : >> { %v760_v15 = vpop.f32.mrf.mxu1  ;;  %v954_v16 = vadd.f32 %v949_v11, %v857_v13 }
  0xd7   : >> { %v764_v20 = vadd.f32 %v760_v15, %v679_v14 }
  0xdb   : >> { %v854_v18 = vpop.f32.mrf.mxu2 }
  0xdc   : >> { %v858_v22 = vadd.f32 %v854_v18, %v764_v20 }
  0xdd   : >> { %v951_v24 = vpop.f32.mrf.mxu3 }
  0xde   : >> { %v955_v25 = vadd.f32 %v951_v24, %v858_v22 }
  0xec   : >> { %v1034_v19 = vpop.f32.mrf.mxu0 }
  0xed   : >> { %v1039_v21 = vadd.f32 %v1034_v19, %v954_v16 }
  0xef   : >> { %v1045_v23 = vadd.f32 %v1735_v17, %v1039_v21 }
  0xf1   : >> { %1049 = vst [vmem:[%s1048_s9] sm:$0xff] %v1045_v23  ;;  %v1059_v29 = vmul.f32 %v1045_v23, %v1045_v23 }
  0xf4   : >> { %v1036_v26 = vpop.f32.mrf.mxu0 }
  0xf5   : >> { %v1040_v27 = vadd.f32 %v1036_v26, %v955_v25 }
  0xf7   : >> { %v1046_v28 = vadd.f32 %v1735_v17, %v1040_v27 }
  0xf9   : >> { %1050 = vst [vmem:[%s1048_s9 + $0x8] sm:$0xff] %v1046_v28  ;;  %v1051_v30 = vadd.f32 %v1046_v28, %v1045_v23  ;;  %v1060_v31 = vmul.f32 %v1046_v28, %v1046_v28 }
  0xfb   : >> { %v1052_v32 = vrot.slane %v1051_v30, 4  ;;  %v1061_v33 = vadd.f32 %v1060_v31, %v1059_v29 }
  0xfd   : >> { %v1053_v34 = vadd.f32 %v1052_v32, %v1051_v30  ;;  %v1062_v35 = vrot.slane %v1061_v33, 4 }
  0xff   : >> { %v1054_v36 = vrot.slane %v1053_v34, 2  ;;  %v1063_v37 = vadd.f32 %v1062_v35, %v1061_v33 }
 0x101   : >> { %v1055_v38 = vadd.f32 %v1054_v36, %v1053_v34  ;;  %v1064_v39 = vrot.slane %v1063_v37, 2 }
 0x103   : >> { %v1056_v40 = vrot.slane %v1055_v38, 1  ;;  %v1065_v41 = vadd.f32 %v1064_v39, %v1063_v37 }
 0x105   : >> { %v1057_v42 = vadd.f32 %v1056_v40, %v1055_v38  ;;  %v1066_v43 = vrot.slane %v1065_v41, 1 }
 0x107   : >> { %v1058_v44 = vadd.f32 %v1762_v1, %v1057_v42   ;;  %v1067_v45 = vadd.f32 %v1066_v43, %v1065_v41  ;;  %213 = sbr.rel (!%p211_p4) target bundleno = 15 (0xf), region = 93 }
 0x109   : >> { %v1068_v46 = vadd.f32 %v1758_v0, %v1067_v45   ;;  %v2100_v1 = vmov %v1058_v44  ;;  %1069 = vst [vmem:[%s1814_s28] sm:$0x1] (%p211_p4), %v1058_v44 }
 0x10b   : >> { %v2099_v0 = vmov %v1068_v46  ;;  %1070 = vst [vmem:[%s1814_s28 + $0x1] sm:$0x1] (%p211_p4), %v1068_v46 }
 0x10c PF: > { %s15_s15 = sadd.s32 1, %s1754_s15  }
 0x10d   : > { %p12_p5 = scmp.ge.s32.totalorder %s15_s15, 4  }
 0x10f   :  { %14 = sbr.rel (!%p12_p5) target bundleno = 1 (0x1), region = 104 }

</bundles_post_ra>
